<compile_context>
chip_gen: v5e
topology: v5e:2x2
jax: 0.10.0
libtpu: 0.0.40
codegen_flags: <defaults>
</compile_context>

<pallas_src>
import jax
import jax.numpy as jnp
from jax.experimental import pallas as pl
from jax.experimental.pallas import tpu as pltpu


def cbow_kernel(idx_ref, weff_ref, b1_ref, w2_ref, b2_ref, out_ref):
    tb, n_ctx = idx_ref.shape          # (block_b, 8)
    vocab = weff_ref.shape[0]          # V
    mm_dtype = weff_ref.dtype          # bfloat16 (matmul input dtype)

    # ---- counts[b, v] = #occurrences of v in idx[b, :]  (int32 tree-sum) ----
    lane_ids = jax.lax.broadcasted_iota(jnp.int32, (tb, vocab), dimension=1)
    masks = [(lane_ids == idx_ref[:, i:i + 1]).astype(jnp.int32)
             for i in range(n_ctx)]
    while len(masks) > 1:              # depth-3 tree for n_ctx = 8
        nxt = [masks[j] + masks[j + 1] for j in range(0, len(masks) - 1, 2)]
        if len(masks) % 2:
            nxt.append(masks[-1])
        masks = nxt
    counts = masks[0].astype(mm_dtype)  # single cast; counts <= 8 exact in bf16

    # ---- h = relu(counts @ W_eff + b1),  W_eff = emb @ w1  (folded) ---------
    h = jnp.dot(counts, weff_ref[...],
                preferred_element_type=jnp.float32) + b1_ref[...]
    h = jnp.maximum(h, 0.0)

    # ---- logits = h @ w2 + b2 ------------------------------------------------
    logits = jnp.dot(h.astype(mm_dtype), w2_ref[...],
                     preferred_element_type=jnp.float32) + b2_ref[...]

    # ---- out = log_softmax(logits, axis=1)  (f32 elementwise) ----------------
    m = jnp.max(logits, axis=1, keepdims=True)
    shifted = logits - m
    lse = jnp.log(jnp.sum(jnp.exp(shifted), axis=1, keepdims=True))
    out_ref[...] = (shifted - lse).astype(out_ref.dtype)


def cbow_forward(idx, w_eff, b1, w2, b2, *, block_b=128):
    """Batched CBOW forward.

    idx:   (B, n_ctx) int32 context indices
    w_eff: (V, H) bf16  — precomputed (embedding_table @ W1)
    b1:    (1, H) f32
    w2:    (H, V) bf16
    b2:    (1, V) f32
    returns (B, V) f32 log-probs.
    """
    B, n_ctx = idx.shape
    V, H = w_eff.shape
    assert B % block_b == 0, "batch must be a multiple of block_b"
    # TODO(synk): pad / mask a tail block for arbitrary B not divisible by block_b.

    flops = 2 * B * (V * H + H * V)
    transcendentals = B * V + B        # exp over (B, V) + one log per row
    bytes_accessed = int(
        idx.size * idx.dtype.itemsize
        + w_eff.size * w_eff.dtype.itemsize
        + b1.size * b1.dtype.itemsize
        + w2.size * w2.dtype.itemsize
        + b2.size * b2.dtype.itemsize
        + B * V * 4
    )
    cost = pl.CostEstimate(flops=flops, transcendentals=transcendentals,
                           bytes_accessed=bytes_accessed)

    return pl.pallas_call(
        cbow_kernel,
        out_shape=jax.ShapeDtypeStruct((B, V), jnp.float32),
        grid=(B // block_b,),
        in_specs=[
            pl.BlockSpec((block_b, n_ctx), lambda b: (b, 0)),   # indices (per block)
            pl.BlockSpec((V, H), lambda b: (0, 0)),             # W_eff (VMEM-resident)
            pl.BlockSpec((1, H), lambda b: (0, 0)),             # b1
            pl.BlockSpec((H, V), lambda b: (0, 0)),             # w2
            pl.BlockSpec((1, V), lambda b: (0, 0)),             # b2
        ],
        out_specs=pl.BlockSpec((block_b, V), lambda b: (b, 0)), # lane-dense output
        compiler_params=pltpu.CompilerParams(
            dimension_semantics=("parallel",),
            vmem_limit_bytes=16 * 1024 * 1024,
        ),
        cost_estimate=cost,
    )(idx, w_eff, b1, w2, b2)


# ---- references --------------------------------------------------------------

def reference_kernel_math(idx, w_eff_bf, b1, w2_bf, b2):
    """jnp mirror of the kernel's math (bf16 matmul inputs, f32 accumulation)."""
    V = w_eff_bf.shape[0]
    counts = jax.nn.one_hot(idx, V, dtype=jnp.float32).sum(axis=1)        # (B, V)
    h = jnp.maximum(jnp.dot(counts.astype(jnp.bfloat16), w_eff_bf,
                            preferred_element_type=jnp.float32) + b1, 0.0)
    logits = jnp.dot(h.astype(jnp.bfloat16), w2_bf,
                     preferred_element_type=jnp.float32) + b2
    return jax.nn.log_softmax(logits, axis=1)


def reference_module_fwd(idx, emb, w1, b1, w2, b2):
    """PyTorch-module semantics in pure f32, applied per row of the batch."""
    embeds = jnp.sum(emb[idx], axis=1)                                     # (B, E)
    h = jnp.maximum(embeds @ w1 + b1, 0.0)
    logits = h @ w2 + b2
    return jax.nn.log_softmax(logits, axis=1)


if __name__ == "__main__":
    # CBOW hyperparameters (hidden size 128 fixed by the module definition).
    vocab_size = 256
    embedding_dim = 32
    context_size = 4
    hidden = 128
    n_ctx = 2 * context_size
    batch = 256                      # two grid steps of 128 rows (both v7x TCs busy)

    key = jax.random.PRNGKey(0)
    k_emb, k_w1, k_b1, k_w2, k_b2, k_idx = jax.random.split(key, 6)

    emb_f32 = jax.random.normal(k_emb, (vocab_size, embedding_dim), jnp.float32)
    w1_f32 = jax.random.normal(k_w1, (embedding_dim, hidden), jnp.float32) * 0.1
    b1 = jax.random.normal(k_b1, (1, hidden), jnp.float32) * 0.1
    w2_f32 = jax.random.normal(k_w2, (hidden, vocab_size), jnp.float32) * 0.1
    b2 = jax.random.normal(k_b2, (1, vocab_size), jnp.float32) * 0.1

    # Deployed (kernel) parameters: fold emb@w1 in f32, store bf16; f32 biases.
    w_eff = jnp.dot(emb_f32, w1_f32,
                    preferred_element_type=jnp.float32).astype(jnp.bfloat16)
    w2 = w2_f32.astype(jnp.bfloat16)

    idx = jax.random.randint(k_idx, (batch, n_ctx), 0, vocab_size, jnp.int32)

    out = cbow_forward(idx, w_eff, b1, w2, b2)
    out = jax.block_until_ready(out)
    assert out.shape == (batch, vocab_size)

    # 1) Tight check: kernel matches its own math (bf16 inputs, f32 accum).
    ref_tight = reference_kernel_math(idx, w_eff, b1, w2, b2)
    assert jnp.allclose(out, ref_tight, atol=2e-3, rtol=2e-3), \
        "mismatch vs bf16-path reference"

    # 2) Semantic check: matches the f32 module forward (original unfused
    #    parameters) to within bf16-compute tolerance.
    ref_f32 = reference_module_fwd(idx, emb_f32, w1_f32, b1, w2_f32, b2)
    assert jnp.allclose(out, ref_f32, atol=8e-2, rtol=0.0), \
        "mismatch vs f32 module reference"

    print("KERNEL_OK")
</pallas_src>

<mosaic_0001>
module attributes {stable_mosaic.version = 11 : i64} {
  func.func @cbow_kernel(%arg0: i32, %arg1: memref<128x8xi32, #tpu.memory_space<vmem>>, %arg2: memref<256x128xbf16, #tpu.memory_space<vmem>>, %arg3: memref<1x128xf32, #tpu.memory_space<vmem>>, %arg4: memref<128x256xbf16, #tpu.memory_space<vmem>>, %arg5: memref<1x256xf32, #tpu.memory_space<vmem>>, %arg6: memref<128x256xf32, #tpu.memory_space<vmem>>) attributes {dimension_semantics = [#tpu.dimension_semantics<parallel>], iteration_bounds = array<i64: 2>, scalar_prefetch = 0 : i64, scratch_operands = 0 : i64, tpu.core_type = #tpu.core_type<tc>, window_params = [{transform_indices = @transform_0, window_bounds = array<i64: 128, 8>}, {pipeline_mode = #tpu.pipeline_mode<synchronous>, transform_indices = @transform_1, window_bounds = array<i64: 256, 128>}, {pipeline_mode = #tpu.pipeline_mode<synchronous>, transform_indices = @transform_2, window_bounds = array<i64: 1, 128>}, {pipeline_mode = #tpu.pipeline_mode<synchronous>, transform_indices = @transform_3, window_bounds = array<i64: 128, 256>}, {pipeline_mode = #tpu.pipeline_mode<synchronous>, transform_indices = @transform_4, window_bounds = array<i64: 1, 256>}, {transform_indices = @transform_5, window_bounds = array<i64: 128, 256>}]} {
    %0 = tpu.iota {dimensions = array<i32: 1>} : vector<128x256xi32>
    %c0 = arith.constant 0 : index
    %c0_0 = arith.constant 0 : index
    %1 = vector.load %arg1[%c0, %c0_0] : memref<128x8xi32, #tpu.memory_space<vmem>>, vector<128x1xi32>
    %2 = vector.broadcast %1 : vector<128x1xi32> to vector<128x256xi32>
    %3 = arith.cmpi eq, %0, %2 : vector<128x256xi32>
    %4 = arith.extui %3 : vector<128x256xi1> to vector<128x256xi32>
    %c0_1 = arith.constant 0 : index
    %c1 = arith.constant 1 : index
    %5 = vector.load %arg1[%c0_1, %c1] : memref<128x8xi32, #tpu.memory_space<vmem>>, vector<128x1xi32>
    %6 = vector.broadcast %5 : vector<128x1xi32> to vector<128x256xi32>
    %7 = arith.cmpi eq, %0, %6 : vector<128x256xi32>
    %8 = arith.extui %7 : vector<128x256xi1> to vector<128x256xi32>
    %c0_2 = arith.constant 0 : index
    %c2 = arith.constant 2 : index
    %9 = vector.load %arg1[%c0_2, %c2] : memref<128x8xi32, #tpu.memory_space<vmem>>, vector<128x1xi32>
    %10 = vector.broadcast %9 : vector<128x1xi32> to vector<128x256xi32>
    %11 = arith.cmpi eq, %0, %10 : vector<128x256xi32>
    %12 = arith.extui %11 : vector<128x256xi1> to vector<128x256xi32>
    %c0_3 = arith.constant 0 : index
    %c3 = arith.constant 3 : index
    %13 = vector.load %arg1[%c0_3, %c3] : memref<128x8xi32, #tpu.memory_space<vmem>>, vector<128x1xi32>
    %14 = vector.broadcast %13 : vector<128x1xi32> to vector<128x256xi32>
    %15 = arith.cmpi eq, %0, %14 : vector<128x256xi32>
    %16 = arith.extui %15 : vector<128x256xi1> to vector<128x256xi32>
    %c0_4 = arith.constant 0 : index
    %c4 = arith.constant 4 : index
    %17 = vector.load %arg1[%c0_4, %c4] : memref<128x8xi32, #tpu.memory_space<vmem>>, vector<128x1xi32>
    %18 = vector.broadcast %17 : vector<128x1xi32> to vector<128x256xi32>
    %19 = arith.cmpi eq, %0, %18 : vector<128x256xi32>
    %20 = arith.extui %19 : vector<128x256xi1> to vector<128x256xi32>
    %c0_5 = arith.constant 0 : index
    %c5 = arith.constant 5 : index
    %21 = vector.load %arg1[%c0_5, %c5] : memref<128x8xi32, #tpu.memory_space<vmem>>, vector<128x1xi32>
    %22 = vector.broadcast %21 : vector<128x1xi32> to vector<128x256xi32>
    %23 = arith.cmpi eq, %0, %22 : vector<128x256xi32>
    %24 = arith.extui %23 : vector<128x256xi1> to vector<128x256xi32>
    %c0_6 = arith.constant 0 : index
    %c6 = arith.constant 6 : index
    %25 = vector.load %arg1[%c0_6, %c6] : memref<128x8xi32, #tpu.memory_space<vmem>>, vector<128x1xi32>
    %26 = vector.broadcast %25 : vector<128x1xi32> to vector<128x256xi32>
    %27 = arith.cmpi eq, %0, %26 : vector<128x256xi32>
    %28 = arith.extui %27 : vector<128x256xi1> to vector<128x256xi32>
    %c0_7 = arith.constant 0 : index
    %c7 = arith.constant 7 : index
    %29 = vector.load %arg1[%c0_7, %c7] : memref<128x8xi32, #tpu.memory_space<vmem>>, vector<128x1xi32>
    %30 = vector.broadcast %29 : vector<128x1xi32> to vector<128x256xi32>
    %31 = arith.cmpi eq, %0, %30 : vector<128x256xi32>
    %32 = arith.extui %31 : vector<128x256xi1> to vector<128x256xi32>
    %33 = arith.addi %4, %8 : vector<128x256xi32>
    %34 = arith.addi %12, %16 : vector<128x256xi32>
    %35 = arith.addi %20, %24 : vector<128x256xi32>
    %36 = arith.addi %28, %32 : vector<128x256xi32>
    %37 = arith.addi %33, %34 : vector<128x256xi32>
    %38 = arith.addi %35, %36 : vector<128x256xi32>
    %39 = arith.addi %37, %38 : vector<128x256xi32>
    %40 = arith.sitofp %39 : vector<128x256xi32> to vector<128x256xbf16>
    %c0_8 = arith.constant 0 : index
    %c0_9 = arith.constant 0 : index
    %41 = vector.load %arg2[%c0_8, %c0_9] : memref<256x128xbf16, #tpu.memory_space<vmem>>, vector<256x128xbf16>
    %cst = arith.constant dense<0.000000e+00> : vector<128x128xf32>
    %42 = tpu.matmul %40, %41, %cst {dimension_numbers = #tpu.dot_dimension_numbers<[1], [0], [0], [1], [0, 0, 1, 1], [], []>} : vector<128x256xbf16>, vector<256x128xbf16>, vector<128x128xf32> -> vector<128x128xf32>
    %c0_10 = arith.constant 0 : index
    %c0_11 = arith.constant 0 : index
    %43 = vector.load %arg3[%c0_10, %c0_11] : memref<1x128xf32, #tpu.memory_space<vmem>>, vector<1x128xf32>
    %44 = vector.broadcast %43 : vector<1x128xf32> to vector<128x128xf32>
    %45 = arith.addf %42, %44 : vector<128x128xf32>
    %cst_12 = arith.constant 0.000000e+00 : f32
    %46 = vector.broadcast %cst_12 : f32 to vector<128x128xf32>
    %47 = arith.maximumf %45, %46 : vector<128x128xf32>
    %48 = arith.truncf %47 : vector<128x128xf32> to vector<128x128xbf16>
    %c0_13 = arith.constant 0 : index
    %c0_14 = arith.constant 0 : index
    %49 = vector.load %arg4[%c0_13, %c0_14] : memref<128x256xbf16, #tpu.memory_space<vmem>>, vector<128x256xbf16>
    %cst_15 = arith.constant dense<0.000000e+00> : vector<128x256xf32>
    %50 = tpu.matmul %48, %49, %cst_15 {dimension_numbers = #tpu.dot_dimension_numbers<[1], [0], [0], [1], [0, 0, 1, 1], [], []>} : vector<128x128xbf16>, vector<128x256xbf16>, vector<128x256xf32> -> vector<128x256xf32>
    %c0_16 = arith.constant 0 : index
    %c0_17 = arith.constant 0 : index
    %51 = vector.load %arg5[%c0_16, %c0_17] : memref<1x256xf32, #tpu.memory_space<vmem>>, vector<1x256xf32>
    %52 = vector.broadcast %51 : vector<1x256xf32> to vector<128x256xf32>
    %53 = arith.addf %50, %52 : vector<128x256xf32>
    %cst_18 = arith.constant dense<0xFF800000> : vector<128xf32>
    %54 = vector.multi_reduction <maximumf>, %53, %cst_18 [1] : vector<128x256xf32> to vector<128xf32>
    %55 = vector.shape_cast %54 : vector<128xf32> to vector<128x1xf32>
    %56 = vector.broadcast %55 : vector<128x1xf32> to vector<128x256xf32>
    %57 = arith.subf %53, %56 : vector<128x256xf32>
    %58 = math.exp %57 : vector<128x256xf32>
    %cst_19 = arith.constant dense<0.000000e+00> : vector<128xf32>
    %59 = vector.multi_reduction <add>, %58, %cst_19 [1] : vector<128x256xf32> to vector<128xf32>
    %60 = vector.shape_cast %59 : vector<128xf32> to vector<128x1xf32>
    %61 = math.log %60 : vector<128x1xf32>
    %62 = vector.broadcast %61 : vector<128x1xf32> to vector<128x256xf32>
    %63 = arith.subf %57, %62 : vector<128x256xf32>
    %c0_20 = arith.constant 0 : index
    %c0_21 = arith.constant 0 : index
    %64 = vector.load %arg6[%c0_20, %c0_21] : memref<128x256xf32, #tpu.memory_space<vmem>>, vector<128x256xf32>
    tpu.vector_store %arg6[%c0_20, %c0_21], %63 {strides = array<i32>} : memref<128x256xf32, #tpu.memory_space<vmem>>, vector<128x256xf32>,
    return
  }
  func.func @transform_0(%arg0: i32) -> (i32, i32) {
    %c0_i32 = arith.constant 0 : i32
    %c0_i32_0 = arith.constant 0 : i32
    return %arg0, %c0_i32 : i32, i32
  }
  func.func @transform_1(%arg0: i32) -> (i32, i32) {
    %c0_i32 = arith.constant 0 : i32
    %c0_i32_0 = arith.constant 0 : i32
    %c0_i32_1 = arith.constant 0 : i32
    return %c0_i32, %c0_i32_0 : i32, i32
  }
  func.func @transform_2(%arg0: i32) -> (i32, i32) {
    %c0_i32 = arith.constant 0 : i32
    %c0_i32_0 = arith.constant 0 : i32
    %c0_i32_1 = arith.constant 0 : i32
    return %c0_i32, %c0_i32_0 : i32, i32
  }
  func.func @transform_3(%arg0: i32) -> (i32, i32) {
    %c0_i32 = arith.constant 0 : i32
    %c0_i32_0 = arith.constant 0 : i32
    %c0_i32_1 = arith.constant 0 : i32
    return %c0_i32, %c0_i32_0 : i32, i32
  }
  func.func @transform_4(%arg0: i32) -> (i32, i32) {
    %c0_i32 = arith.constant 0 : i32
    %c0_i32_0 = arith.constant 0 : i32
    %c0_i32_1 = arith.constant 0 : i32
    return %c0_i32, %c0_i32_0 : i32, i32
  }
  func.func @transform_5(%arg0: i32) -> (i32, i32) {
    %c0_i32 = arith.constant 0 : i32
    %c0_i32_0 = arith.constant 0 : i32
    return %arg0, %c0_i32 : i32, i32
  }
}

</mosaic_0001>

<bundles_post_ra>
// kernel: tpu_custom_call.1
= control target key start
LH: loop header
LB: loop body
LE: loop exit
PB: predicated region body
PF: predicated region fallthrough
CT: control target
= control target key end

     0   :  { %10 = vsyncpa [#allocation3], 0  ;;  %s4697_s0 = inlined_call_operand.vmem [shape: s32[256,8], index: 0, kind: input, shape index: {}]   ;;  %s4698_s1 = inlined_call_operand.vmem [shape: bf16[256,128], index: 1, kind: input, shape index: {}]   ;;  %s4699_s2 = inlined_call_operand.vmem [shape: f32[1,128], index: 2, kind: input, shape index: {}]   ;;  %s4700_s3 = inlined_call_operand.vmem [shape: bf16[128,256], index: 3, kind: input, shape index: {}]   ;;  %s4701_s4 = inlined_call_operand.vmem [shape: f32[1,256], index: 4, kind: input, shape index: {}]   ;;  %s4702_s5 = inlined_call_operand.hbm [shape: f32[256,256], index: 5, kind: output, shape index: {}]  }
   0x1   :  { %12 = vsyncpa [#allocation3 + $0x1], 0  ;;  %s2744_s18 = smov 0   ;;  %s2746_s19 = smov 0  }
   0x2   :  { %s2748_s20 = smov 0   ;;  %s2750_s21 = smov 0  }
   0x3 LB: > { %s2765_s22 = sadd.s32 4294967295, %s2702_s21   ;;  %s2234_s23 = sadd.s32 4294967294, %s2702_s21   ;;  %s2702_s21 = sphi %s2750_s21, %s4794_s21   ;;  %s2698_s20 = sphi %s2748_s20, %s4793_s20   ;;  %s2694_s19 = sphi %s2746_s19, %s4792_s19   ;;  %s2690_s18 = sphi %s2744_s18, %s4791_s18  }
   0x4   : > { %s2769_s24 = sadd.s32 1, %s2702_s21   ;;  %s135_s25 = sadd.s32 1, %s2698_s20 }
   0x5   : > { %s132_s26 = ssub.s32 %s2702_s21, %s2769_s24  ;;  %p145_p0 = scmp.ne.s32.totalorder %s2698_s20, %s2694_s19 }
   0x6   : > { %p133_p1 = scmp.eq.s32.totalorder %s132_s26, 0  ;;  %p146_p2 = scmp.eq.s32.totalorder %s2765_s22, 1 }
   0x7   : > { %p151_p3 = scmp.ne.s32.totalorder %s2694_s19, %s2690_s18  ;;  %p152_p4 = scmp.eq.s32.totalorder %s2234_s23, 1 }
   0x8   : > { %s2780_s27 = scalar_select %p133_p1, %s2698_s20, %s135_s25  }
   0x9   : > { %p2782_p5 = por %p146_p2, %p145_p0  ;;  %p2786_p6 = por %p152_p4, %p151_p3 }
   0xa   : > { %p2237_p7 = scmp.ge.s32.totalorder %s2702_s21, 1  ;;  %p191_p8 = scmp.lt.s32.totalorder %s2702_s21, 3 }
   0xc   : > { %p192_p9 = pnand %p2237_p7, %p191_p8 }
   0xe   : > { %195 = sbr.rel (%p192_p9) target bundleno = 1120 (0x460), region = 40 }
  0x13   : > { %s2239_s30 = sshll.u32 %s2765_s22, 4  ;;  %v4726_v0 = vmov 0   ;;  %v2705_v17 = vmov 1   ;;  %v2706_v18 = vmov 2   ;;  %v4703_v27 = vmov 4   ;;  %s216_s17 = sand.u32 1, %s2694_s19  }
  0x14   : > { %2460 = vset.pattern.permute.xlu2 %v4726_v0  ;;  %2459 = vset.pattern.permute.xlu1 %v4726_v0  ;;  %p220_p10 = scmp.lt.s32.totalorder %s2239_s30, 31  ;;  %v4711_v30 = vmov 3   ;;  %v4705_v33 = vmov 6   ;;  %v4707_v37 = vmov 5   ;;  %v4709_v41 = vmov 7   ;;  %s2238_s23 = sshll.u32 %s216_s17, 8 }
  0x15   : > { %2458 = vset.pattern.permute.xlu0 %v4726_v0  ;;  %v226_v63 = vlaneseq  ;;  %s4583_s25 = scalar_lea.vmem [#allocation2], %s2238_s23  ;;  %s2408_s26 = sshll.u32 %s2765_s22, 8 }
  0x16   : > { %s4796_s30 = smov (!%p220_p10, %s2239_s30), 31  ;;  %s2168_s7 = scalar_lea.hbm %s4702_s5, %s2408_s26 }
  0x17   : > { %s2240_s6 = sshll.u32 %s4796_s30, 3  ;;  %s2169_s8 = sshll.u32 %s4583_s25, 4  ;;  %s2170_s8 = int_to_ptr.vmem [resolvable:$true] %s2169_s8 }
  0x18   : > { %s2799_s9 = scalar_lea.vmem %s4697_s0, %s2240_s6  ;;  %s2156_s22 = scalar_lea.sflag [#allocation3], %s216_s17 }
  0x19   : > { %v2802_v1 = vld [vmem:[%s2799_s9 + $0x20] sm:$0xff]  ;;  %v2805_v2 = vld [vmem:[%s2799_s9 + $0x10] sm:$0xff]  ;;  %v2814_v4 = vld [vmem:[%s2799_s9 + $0x28] sm:$0xff]  ;;  %s2660_s14 = scalar_lea.hbm %s4702_s5, 512 }
  0x1a   : > { %v2808_v3 = vld [vmem:[%s2799_s9] sm:$0xff]  ;;  %258 = vperm.xlu2 %2460, %v2802_v1   ;;  %252 = vperm.xlu1 %2459, %v2805_v2   ;;  %v2817_v5 = vld [vmem:[%s2799_s9 + $0x18] sm:$0xff]  ;;  %v2820_v6 = vld [vmem:[%s2799_s9 + $0x8] sm:$0xff] }
  0x1b   : > { %246 = vperm.xlu0 %2458, %v2808_v3   ;;  %v2826_v7 = vld [vmem:[%s2799_s9 + $0x40] sm:$0xff]  ;;  %v2829_v8 = vld [vmem:[%s2799_s9 + $0x38] sm:$0xff]  ;;  %v2832_v9 = vld [vmem:[%s2799_s9 + $0x30] sm:$0xff] }
  0x1c   : > { %v2838_v10 = vld [vmem:[%s2799_s9 + $0x58] sm:$0xff]  ;;  %v2841_v11 = vld [vmem:[%s2799_s9 + $0x50] sm:$0xff]  ;;  %v2844_v12 = vld [vmem:[%s2799_s9 + $0x48] sm:$0xff] }
  0x1d   : > { %v2850_v13 = vld [vmem:[%s2799_s9 + $0x70] sm:$0xff]  ;;  %v2853_v14 = vld [vmem:[%s2799_s9 + $0x68] sm:$0xff]  ;;  %v2856_v15 = vld [vmem:[%s2799_s9 + $0x60] sm:$0xff] }
  0x1e   : > { %v2862_v16 = vld [vmem:[%s2799_s9 + $0x78] sm:$0xff] }
  0x22   : > { %261 = vperm.xlu2 %2460, %v2814_v4   ;;  %255 = vperm.xlu1 %2459, %v2817_v5  }
  0x23   : > { %249 = vperm.xlu0 %2458, %v2820_v6  }
  0x2a   : > { %270 = vperm.xlu2 %2460, %v2826_v7   ;;  %267 = vperm.xlu1 %2459, %v2829_v8  }
  0x2b   : > { %264 = vperm.xlu0 %2458, %v2832_v9  }
  0x32   : > { %279 = vperm.xlu2 %2460, %v2838_v10   ;;  %276 = vperm.xlu1 %2459, %v2841_v11  }
  0x33   : > { %273 = vperm.xlu0 %2458, %v2844_v12  }
  0x3a   : > { %288 = vperm.xlu2 %2460, %v2850_v13   ;;  %285 = vperm.xlu1 %2459, %v2853_v14  }
  0x3b   : > { %282 = vperm.xlu0 %2458, %v2856_v15  }
  0x42   : > { %2462 = vset.pattern.permute.xlu2 %v2705_v17  ;;  %2461 = vset.pattern.permute.xlu1 %v2705_v17 }
  0x43   : > { %291 = vperm.xlu0 %2458, %v2862_v16   ;;  %361 = vperm.xlu2 %2462, %v2820_v6  }
  0x44   : > { %358 = vperm.xlu1 %2461, %v2808_v3  }
  0x4b   : > { %2463 = vset.pattern.permute.xlu0 %v2705_v17  ;;  %370 = vperm.xlu2 %2462, %v2802_v1  }
  0x4c   : > { %367 = vperm.xlu1 %2461, %v2817_v5   ;;  %364 = vperm.xlu0 %2463, %v2805_v2  }
  0x53   : > { %376 = vperm.xlu2 %2462, %v2832_v9  }
  0x54   : > { %373 = vperm.xlu1 %2461, %v2814_v4   ;;  %379 = vperm.xlu0 %2463, %v2829_v8  }
  0x5b   : > { %385 = vperm.xlu2 %2462, %v2844_v12  }
  0x5c   : > { %382 = vperm.xlu1 %2461, %v2826_v7   ;;  %388 = vperm.xlu0 %2463, %v2841_v11  }
  0x63   : > { %394 = vperm.xlu2 %2462, %v2856_v15  }
  0x64   : > { %391 = vperm.xlu1 %2461, %v2838_v10   ;;  %397 = vperm.xlu0 %2463, %v2853_v14  }
  0x6b   : > { %403 = vperm.xlu2 %2462, %v2862_v16  }
  0x6c   : > { %400 = vperm.xlu1 %2461, %v2850_v13   ;;  %2464 = vset.pattern.permute.xlu0 %v2706_v18 }
  0x6d   : > { %470 = vperm.xlu0 %2464, %v2808_v3  }
  0x73   : > { %2466 = vset.pattern.permute.xlu2 %v2706_v18 }
  0x74   : > { %2465 = vset.pattern.permute.xlu1 %v2706_v18  ;;  %476 = vperm.xlu2 %2466, %v2805_v2   ;;  %v2883_v19 = vpop.permute.xlu2 %258 }
  0x75   : > { %473 = vperm.xlu1 %2465, %v2820_v6   ;;  %485 = vperm.xlu0 %2464, %v2814_v4  }
  0x7c   : > { %482 = vperm.xlu2 %2466, %v2802_v1   ;;  %v2888_v20 = vpop.permute.xlu2 %261 }
  0x7d   : > { %479 = vperm.xlu1 %2465, %v2817_v5   ;;  %494 = vperm.xlu0 %2464, %v2826_v7  }
  0x84   : > { %491 = vperm.xlu2 %2466, %v2829_v8   ;;  %v2893_v21 = vpop.permute.xlu2 %270 }
  0x85   : > { %4737 = vst [vmem:[#allocation5_spill] sm:$0xff] %v2893_v21  ;;  %488 = vperm.xlu1 %2465, %v2832_v9   ;;  %503 = vperm.xlu0 %2464, %v2838_v10   ;;  %v4755_v21 = vmov 7  }
  0x8c   : > { %v2897_v22 = vpop.permute.xlu1 %252  ;;  %500 = vperm.xlu2 %2466, %v2841_v11   ;;  %v2900_v23 = vpop.permute.xlu2 %279 }
  0x8d   : > { %4738 = vst [vmem:[#allocation6_spill] sm:$0xff] %v2900_v23  ;;  %497 = vperm.xlu1 %2465, %v2844_v12   ;;  %512 = vperm.xlu0 %2464, %v2850_v13   ;;  %v2904_v24 = vpop.permute.xlu0 %246 }
  0x94   : > { %v2906_v25 = vpop.permute.xlu1 %255  ;;  %509 = vperm.xlu2 %2466, %v2853_v14   ;;  %v2909_v26 = vpop.permute.xlu2 %288 }
  0x95   : > { %4739 = vst [vmem:[#allocation7_spill] sm:$0xff] %v2909_v26  ;;  %506 = vperm.xlu1 %2465, %v2856_v15   ;;  %2469 = vset.pattern.permute.xlu0 %v4703_v27  ;;  %v2913_v28 = vpop.permute.xlu0 %249 }
  0x96   : > { %694 = vperm.xlu0 %2469, %v2808_v3  }
  0x9c   : > { %v2916_v29 = vpop.permute.xlu1 %267  ;;  %2467 = vset.pattern.permute.xlu2 %v4711_v30 }
  0x9d   : > { %515 = vperm.xlu1 %2465, %v2862_v16   ;;  %v2920_v31 = vpop.permute.xlu2 %361  ;;  %582 = vperm.xlu2 %2467, %v2808_v3   ;;  %v2923_v32 = vpop.permute.xlu0 %264 }
  0x9e   : > { %2474 = vset.pattern.permute.xlu0 %v4705_v33 }
  0x9f   : > { %921 = vperm.xlu0 %2474, %v2820_v6  }
  0xa4   : > { %v2927_v34 = vpop.permute.xlu1 %276 }
  0xa5   : > { %4740 = vst [vmem:[#allocation8_spill] sm:$0xff] %v2927_v34  ;;  %2468 = vset.pattern.permute.xlu1 %v4711_v30  ;;  %v2930_v35 = vpop.permute.xlu2 %370  ;;  %591 = vperm.xlu2 %2467, %v2817_v5   ;;  %v2933_v36 = vpop.permute.xlu0 %273 }
  0xa6   : > { %588 = vperm.xlu1 %2468, %v2805_v2  }
  0xa7   : > { %2479 = vset.pattern.permute.xlu0 %v4707_v37 }
  0xa8   : > { %812 = vperm.xlu0 %2479, %v2805_v2  }
  0xac   : > { %v2938_v38 = vpop.permute.xlu1 %285 }
  0xad   : > { %4741 = vst [vmem:[#allocation9_spill] sm:$0xff] %v2938_v38  ;;  %v2940_v39 = vpop.permute.xlu2 %376  ;;  %597 = vperm.xlu2 %2467, %v2814_v4   ;;  %v2943_v40 = vpop.permute.xlu0 %282 }
  0xae   : > { %4742 = vst [vmem:[#allocation10_spill] sm:$0xff] %v2943_v40  ;;  %594 = vperm.xlu1 %2468, %v2802_v1  }
  0xb0   : > { %2484 = vset.pattern.permute.xlu0 %v4709_v41 }
  0xb1   : > { %1039 = vperm.xlu0 %2484, %v2817_v5  }
  0xb5   : > { %v2948_v42 = vpop.permute.xlu2 %385  ;;  %2471 = vset.pattern.permute.xlu2 %v4707_v37  ;;  %v2951_v43 = vpop.permute.xlu0 %291 }
  0xb6   : > { %4743 = vst [vmem:[#allocation11_spill] sm:$0xff] %v2951_v43  ;;  %2470 = vset.pattern.permute.xlu1 %v4703_v27  ;;  %v2954_v44 = vpop.permute.xlu1 %358  ;;  %806 = vperm.xlu2 %2471, %v2808_v3  }
  0xb7   : > { %697 = vperm.xlu1 %2470, %v2820_v6  }
  0xb9   : > { %2485 = vset.pattern.permute.xlu0 %v4711_v30 }
  0xba   : > { %585 = vperm.xlu0 %2485, %v2820_v6  }
  0xbd   : > { %v2960_v45 = vpop.permute.xlu2 %394 }
  0xbe   : > { %4744 = vst [vmem:[#allocation12_spill] sm:$0xff] %v2960_v45  ;;  %v2962_v46 = vpop.permute.xlu1 %367  ;;  %v2964_v47 = vpop.permute.xlu0 %364  ;;  %2473 = vset.pattern.permute.xlu2 %v4705_v33 }
  0xbf   : > { %2472 = vset.pattern.permute.xlu1 %v4707_v37  ;;  %918 = vperm.xlu2 %2473, %v2808_v3  }
  0xc0   : > { %809 = vperm.xlu1 %2472, %v2820_v6  }
  0xc2   : > { %603 = vperm.xlu0 %2485, %v2829_v8  }
  0xc5   : > { %v2975_v50 = vpop.permute.xlu2 %403 }
  0xc6   : > { %v2971_v48 = vpop.permute.xlu1 %373  ;;  %v2973_v49 = vpop.permute.xlu0 %379  ;;  %4745 = vst [vmem:[#allocation13_spill] sm:$0xff] %v2975_v50 }
  0xc7   : > { %2476 = vset.pattern.permute.xlu2 %v4709_v41 }
  0xc8   : > { %2475 = vset.pattern.permute.xlu1 %v4709_v41  ;;  %1033 = vperm.xlu2 %2476, %v2820_v6  }
  0xc9   : > { %1030 = vperm.xlu1 %2475, %v2808_v3   ;;  %v3019_v3 = vand.u32 127, %v226_v63 }
  0xca   : > { %609 = vperm.xlu0 %2485, %v2844_v12  }
  0xcb   : > { %v3032_v17 = vadd.s32 128, %v3019_v3  ;;  %vm293_vm0 = vcmp.eq.s32.totalorder %v3019_v3, %v2904_v24  ;;  %vm405_vm2 = vcmp.eq.s32.totalorder %v3019_v3, %v2954_v44  ;;  %vm409_vm12 = vcmp.eq.s32.totalorder %v3019_v3, %v2964_v47 }
  0xcc   : > { %v325_v18 = vsel %vm293_vm0, 1, %v4726_v0  ;;  %vm297_vm13 = vcmp.eq.s32.totalorder %v3019_v3, %v2897_v22 }
  0xcd   : > { %vm294_vm1 = vcmp.eq.s32.totalorder %v3032_v17, %v2904_v24  ;;  %vm406_vm3 = vcmp.eq.s32.totalorder %v3032_v17, %v2954_v44  ;;  %v437_v24 = vsel %vm405_vm2, 1, %v4726_v0  ;;  %vm410_vm14 = vcmp.eq.s32.totalorder %v3032_v17, %v2964_v47 }
  0xce   : > { %v2982_v51 = vpop.permute.xlu1 %382  ;;  %v2984_v52 = vpop.permute.xlu0 %388  ;;  %v326_v63 = vsel %vm294_vm1, 1, %v4726_v0  ;;  %vm298_vm15 = vcmp.eq.s32.totalorder %v3032_v17, %v2897_v22  ;;  %v329_v47 = vsel %vm297_vm13, 1, %v4726_v0  ;;  %vm308_vm13 = vcmp.eq.s32.totalorder %v3032_v17, %v2916_v29 }
  0xcf   : > { %4746 = vst [vmem:[#allocation14_spill] sm:$0xff] %v2982_v51  ;;  %v2986_v53 = vpop.permute.xlu2 %476 }
  0xd0   : > { %4747 = vst [vmem:[#allocation15_spill] sm:$0xff] %v2984_v52  ;;  %2478 = vset.pattern.permute.xlu2 %v4703_v27  ;;  %vm521_vm0 = vcmp.eq.s32.totalorder %v3019_v3, %v2986_v53  ;;  %vm522_vm1 = vcmp.eq.s32.totalorder %v3032_v17, %v2986_v53  ;;  %v2386_v53 = vld [vmem:[%s4698_s1 + $0x58] sm:$0xff]  ;;  %v2377_v52 = vld [vmem:[%s4698_s1 + $0x10] sm:$0xff] }
  0xd1   : > { %2477 = vset.pattern.permute.xlu1 %v4703_v27  ;;  %703 = vperm.xlu2 %2478, %v2817_v5  }
  0xd2   : > { %700 = vperm.xlu1 %2477, %v2805_v2   ;;  %2502 = vset.pattern.permute.xlu0 %v4705_v33 }
  0xd3   : > { %930 = vperm.xlu0 %2502, %v2802_v1  }
  0xd6   : > { %v2994_v54 = vpop.permute.xlu1 %391  ;;  %v2996_v55 = vpop.permute.xlu0 %397 }
  0xd7   : > { %4748 = vst [vmem:[#allocation16_spill] sm:$0xff] %v2994_v54  ;;  %v2998_v56 = vpop.permute.xlu2 %482 }
  0xd9   : > { %2481 = vset.pattern.permute.xlu2 %v4705_v33 }
  0xda   : > { %2480 = vset.pattern.permute.xlu1 %v4707_v37  ;;  %924 = vperm.xlu2 %2481, %v2805_v2  }
  0xdb   : > { %815 = vperm.xlu1 %2480, %v2817_v5   ;;  %936 = vperm.xlu0 %2502, %v2832_v9  }
  0xde   : > { %v3005_v57 = vpop.permute.xlu1 %400 }
  0xdf   : > { %4749 = vst [vmem:[#allocation17_spill] sm:$0xff] %v3005_v57  ;;  %v3007_v58 = vpop.permute.xlu2 %491  ;;  %v471_v59 = vpop.permute.xlu0 %470  ;;  %v1141_v57 = vadd.s32 %v437_v24, %v325_v18  ;;  %v2381_v18 = vld [vmem:[%s4698_s1 + $0x30] sm:$0xff] }
  0xe0   : > { %vm517_vm4 = vcmp.eq.s32.totalorder %v3019_v3, %v471_v59  ;;  %vm518_vm5 = vcmp.eq.s32.totalorder %v3032_v17, %v471_v59 }
  0xe1   : > { %v549_v44 = vsel %vm517_vm4, 1, %v4726_v0  ;;  %vm525_vm4 = vcmp.eq.s32.totalorder %v3019_v3, %v2998_v56 }
  0xe2   : > { %2483 = vset.pattern.permute.xlu2 %v4709_v41 }
  0xe3   : > { %2482 = vset.pattern.permute.xlu1 %v4705_v33  ;;  %942 = vperm.xlu0 %2502, %v2826_v7   ;;  %v550_v33 = vsel %vm518_vm5, 1, %v4726_v0  ;;  %vm526_vm5 = vcmp.eq.s32.totalorder %v3032_v17, %v2998_v56 }
  0xe4   : > { %1036 = vperm.xlu2 %2483, %v2805_v2   ;;  %927 = vperm.xlu1 %2482, %v2817_v5  }
  0xe7   : > { %v3014_v60 = vpop.permute.xlu1 %473  ;;  %v3016_v61 = vpop.permute.xlu2 %500 }
  0xe8   : > { %4750 = vst [vmem:[#allocation18_spill] sm:$0xff] %v3016_v61  ;;  %v486_v62 = vpop.permute.xlu0 %485 }
  0xe9   : > { %vm527_vm8 = vcmp.eq.s32.totalorder %v3019_v3, %v486_v62  ;;  %vm528_vm9 = vcmp.eq.s32.totalorder %v3032_v17, %v486_v62 }
  0xeb   : > { %948 = vperm.xlu0 %2502, %v2841_v11  }
  0xec   : > { %2487 = vset.pattern.permute.xlu2 %v4703_v27  ;;  %2486 = vset.pattern.permute.xlu1 %v4703_v27  ;;  %v438_v27 = vsel %vm406_vm3, 1, %v4726_v0 }
  0xed   : > { %709 = vperm.xlu2 %2487, %v2814_v4   ;;  %706 = vperm.xlu1 %2486, %v2802_v1   ;;  %v1142_v26 = vadd.s32 %v438_v27, %v326_v63  ;;  %v2389_v63 = vld [vmem:[%s4698_s1 + $0x70] sm:$0xff] }
  0xef   : > { %v3025_v2 = vpop.permute.xlu1 %479  ;;  %v3027_v5 = vpop.permute.xlu2 %509 }
  0xf0   : > { %4751 = vst [vmem:[#allocation19_spill] sm:$0xff] %v3027_v5  ;;  %v3029_v6 = vpop.permute.xlu0 %494 }
  0xf1   : > { %4752 = vst [vmem:[#allocation20_spill] sm:$0xff] %v3029_v6  ;;  %v4754_v6 = vmov 3  }
  0xf3   : > { %954 = vperm.xlu0 %2502, %v2856_v15  }
  0xf5   : > { %2489 = vset.pattern.permute.xlu2 %v4707_v37  ;;  %2488 = vset.pattern.permute.xlu1 %v4707_v37 }
  0xf6   : > { %821 = vperm.xlu2 %2489, %v2814_v4   ;;  %818 = vperm.xlu1 %2488, %v2802_v1  }
  0xf7   : > { %v3055_v15 = vpop.permute.xlu1 %488  ;;  %v583_v59 = vpop.permute.xlu2 %582 }
  0xf8   : > { %vm629_vm6 = vcmp.eq.s32.totalorder %v3019_v3, %v583_v59  ;;  %vm630_vm7 = vcmp.eq.s32.totalorder %v3032_v17, %v583_v59  ;;  %v3059_v37 = vpop.permute.xlu0 %503  ;;  %v4756_v59 = vmov 6  }
  0xf9   : > { %4753 = vst [vmem:[#allocation21_spill] sm:$0xff] %v3059_v37  ;;  %v661_v41 = vsel %vm629_vm6, 1, %v4726_v0  ;;  %v662_v30 = vsel %vm630_vm7, 1, %v4726_v0 }
  0xfa   : > { %v1173_v54 = vadd.s32 %v661_v41, %v549_v44  ;;  %v1174_v23 = vadd.s32 %v662_v30, %v550_v33  ;;  %v560_v33 = vsel %vm528_vm9, 1, %v4726_v0  ;;  %vm296_vm9 = vcmp.eq.s32.totalorder %v3032_v17, %v2913_v28 }
  0xfb   : > { %2523 = vset.pattern.permute.xlu0 %v4754_v6 }
  0xfc   : > { %v3063_v45 = vadd.s32 %v1173_v54, %v1141_v57  ;;  %v3065_v40 = vadd.s32 %v1174_v23, %v1142_v26  ;;  %615 = vperm.xlu0 %2523, %v2838_v10   ;;  %v2382_v10 = vld [vmem:[%s4698_s1 + $0x38] sm:$0xff] }
  0xfd   : > { %v2390_v23 = vld [vmem:[%s4698_s1 + $0x78] sm:$0xff]  ;;  %1545 = vmatpush.bf16.msra.mxu0 %v2382_v10 }
  0xfe   : > { %2491 = vset.pattern.permute.xlu2 %v4755_v21  ;;  %2490 = vset.pattern.permute.xlu1 %v4756_v59 }
  0xff   : > { %v3071_v37 = vpop.permute.xlu1 %497  ;;  %v3073_v51 = vpop.permute.xlu2 %591  ;;  %1042 = vperm.xlu2 %2491, %v2802_v1   ;;  %933 = vperm.xlu1 %2490, %v2814_v4   ;;  %v559_v1 = vsel %vm527_vm8, 1, %v4726_v0  ;;  %vm295_vm8 = vcmp.eq.s32.totalorder %v3019_v3, %v2913_v28 }
 0x100   : > { %v3077_v27 = vpop.permute.xlu0 %512  ;;  %1594 = vmatpush.bf16.msra.mxu1 %v2390_v23  ;;  %v2388_v23 = vld [vmem:[%s4698_s1 + $0x68] sm:$0xff] }
 0x101   : > { %4757 = vst [vmem:[#allocation22_spill] sm:$0xff] %v3077_v27  ;;  %1546 = vmatpush.bf16.msra.mxu0 %v2381_v18  ;;  %v330_v18 = vsel %vm298_vm15, 1, %v4726_v0  ;;  %vm420_vm15 = vcmp.eq.s32.totalorder %v3032_v17, %v2973_v49 }
 0x104   : > { %621 = vperm.xlu0 %2523, %v2853_v14   ;;  %1595 = vmatpush.bf16.msra.mxu1 %v2389_v63  ;;  %v553_v63 = vsel %vm521_vm0, 1, %v4726_v0  ;;  %vm311_vm0 = vcmp.eq.s32.totalorder %v3019_v3, %v2933_v36 }
 0x107   : > { %v3089_v26 = vpop.permute.xlu1 %506  ;;  %v598_v30 = vpop.permute.xlu2 %597  ;;  %2493 = vset.pattern.permute.xlu2 %v4754_v6  ;;  %2492 = vset.pattern.permute.xlu1 %v4755_v21 }
 0x108   : > { %4758 = vst [vmem:[#allocation23_spill] sm:$0xff] %v3089_v26  ;;  %vm639_vm10 = vcmp.eq.s32.totalorder %v3019_v3, %v598_v30  ;;  %v3095_v14 = vpop.permute.xlu0 %694  ;;  %600 = vperm.xlu2 %2493, %v2832_v9   ;;  %vm640_vm11 = vcmp.eq.s32.totalorder %v3032_v17, %v598_v30  ;;  %1045 = vperm.xlu1 %2492, %v2814_v4   ;;  %v4762_v4 = vmov 4   ;;  %v2387_v30 = vld [vmem:[%s4698_s1 + $0x60] sm:$0xff] }
 0x109   : > { %v671_v41 = vsel %vm639_vm10, 1, %v4726_v0  ;;  %v672_v54 = vsel %vm640_vm11, 1, %v4726_v0  ;;  %1596 = vmatpush.bf16.msra.mxu1 %v2388_v23  ;;  %vm407_vm10 = vcmp.eq.s32.totalorder %v3019_v3, %v2920_v31  ;;  %vm408_vm11 = vcmp.eq.s32.totalorder %v3032_v17, %v2920_v31 }
 0x10a   : > { %v3102_v57 = vadd.s32 %v671_v41, %v559_v1  ;;  %v3104_v62 = vadd.s32 %v672_v54, %v560_v33  ;;  %v2379_v1 = vld [vmem:[%s4698_s1 + $0x20] sm:$0xff]  ;;  %v441_v33 = vsel %vm409_vm12, 1, %v4726_v0  ;;  %v442_v41 = vsel %vm410_vm14, 1, %v4726_v0 }
 0x10b   : > { %v1145_v22 = vadd.s32 %v441_v33, %v329_v47  ;;  %vm307_vm12 = vcmp.eq.s32.totalorder %v3019_v3, %v2916_v29  ;;  %vm419_vm14 = vcmp.eq.s32.totalorder %v3019_v3, %v2973_v49 }
 0x10c   : > { %4759 = vst [vmem:[#allocation24_spill] sm:$0xff] %v3102_v57  ;;  %627 = vperm.xlu0 %2523, %v2862_v16   ;;  %v2380_v16 = vld [vmem:[%s4698_s1 + $0x28] sm:$0xff] }
 0x10d   : > { %4760 = vst [vmem:[#allocation25_spill] sm:$0xff] %v3104_v62  ;;  %1547 = vmatpush.bf16.msra.mxu0 %v2380_v16  ;;  %1597 = vmatpush.bf16.msra.mxu1 %v2387_v30  ;;  %v554_v16 = vsel %vm522_vm1, 1, %v4726_v0  ;;  %v4763_v30 = vmov 5   ;;  %vm312_vm1 = vcmp.eq.s32.totalorder %v3032_v17, %v2933_v36 }
 0x10f   : > { %v3113_v24 = vpop.permute.xlu1 %515 }
 0x110   : > { %4761 = vst [vmem:[#allocation26_spill] sm:$0xff] %v3113_v24  ;;  %2495 = vset.pattern.permute.xlu2 %v4762_v4  ;;  %2494 = vset.pattern.permute.xlu1 %v4762_v4  ;;  %v3119_v10 = vpop.permute.xlu2 %806 }
 0x111   : > { %v3117_v44 = vpop.permute.xlu0 %921  ;;  %715 = vperm.xlu2 %2495, %v2829_v8   ;;  %712 = vperm.xlu1 %2494, %v2832_v9  }
 0x112   : > { %1548 = vmatpush.bf16.msra.mxu0 %v2379_v1  ;;  %1598 = vmatpush.bf16.msra.mxu1 %v2386_v53 }
 0x114   : > { %2532 = vset.pattern.permute.xlu0 %v4756_v59 }
 0x115   : > { %960 = vperm.xlu0 %2532, %v2850_v13   ;;  %v2378_v13 = vld [vmem:[%s4698_s1 + $0x18] sm:$0xff] }
 0x116   : > { %1549 = vmatpush.bf16.msra.mxu0 %v2378_v13 }
 0x118   : > { %v589_v54 = vpop.permute.xlu1 %588 }
 0x119   : > { %vm633_vm2 = vcmp.eq.s32.totalorder %v3019_v3, %v589_v54  ;;  %vm634_vm3 = vcmp.eq.s32.totalorder %v3032_v17, %v589_v54  ;;  %2497 = vset.pattern.permute.xlu2 %v4763_v30  ;;  %2496 = vset.pattern.permute.xlu1 %v4763_v30  ;;  %v3169_v47 = vpop.permute.xlu2 %918  ;;  %v1146_v54 = vadd.s32 %v442_v41, %v330_v18  ;;  %v2385_v41 = vld [vmem:[%s4698_s1 + $0x50] sm:$0xff]  ;;  %v2384_v18 = vld [vmem:[%s4698_s1 + $0x48] sm:$0xff] }
 0x11a   : > { %v665_v23 = vsel %vm633_vm2, 1, %v4726_v0  ;;  %v666_v1 = vsel %vm634_vm3, 1, %v4726_v0  ;;  %v3167_v33 = vpop.permute.xlu0 %812  ;;  %827 = vperm.xlu2 %2497, %v2829_v8   ;;  %824 = vperm.xlu1 %2496, %v2832_v9   ;;  %vm423_vm2 = vcmp.eq.s32.totalorder %v3019_v3, %v2948_v42  ;;  %vm424_vm3 = vcmp.eq.s32.totalorder %v3032_v17, %v2948_v42 }
 0x11b   : > { %v1177_v27 = vadd.s32 %v665_v23, %v553_v63  ;;  %v1178_v26 = vadd.s32 %v666_v1, %v554_v16  ;;  %1550 = vmatpush.bf16.msra.mxu0 %v2377_v52  ;;  %1599 = vmatpush.bf16.msra.mxu1 %v2385_v41  ;;  %v2383_v41 = vld [vmem:[%s4698_s1 + $0x40] sm:$0xff] }
 0x11d   : > { %v3173_v61 = vadd.s32 %v1177_v27, %v1145_v22  ;;  %v3175_v0 = vadd.s32 %v1178_v26, %v1146_v54  ;;  %2536 = vset.pattern.permute.xlu0 %v4755_v21  ;;  %v2376_v26 = vld [vmem:[%s4698_s1 + $0x8] sm:$0xff]  ;;  %v4764_v22 = vmov 0   ;;  %v2375_v54 = vld [vmem:[%s4698_s1] sm:$0xff] }
 0x11e   : > { %v557_v13 = vsel %vm525_vm4, 1, %v4764_v22  ;;  %v558_v53 = vsel %vm526_vm5, 1, %v4764_v22  ;;  %v328_v31 = vsel %vm296_vm9, 1, %v4764_v22  ;;  %v340_v28 = vsel %vm308_vm13, 1, %v4764_v22 }
 0x11f   : > { %1551 = vmatpush.bf16.msra.mxu0 %v2376_v26  ;;  %1600 = vmatpush.bf16.msra.mxu1 %v2384_v18  ;;  %v440_v26 = vsel %vm408_vm11, 1, %v4764_v22  ;;  %v339_v18 = vsel %vm307_vm12, 1, %v4764_v22  ;;  %v451_v29 = vsel %vm419_vm14, 1, %v4764_v22  ;;  %v452_v49 = vsel %vm420_vm15, 1, %v4764_v22 }
 0x120   : > { %v595_v27 = vpop.permute.xlu1 %594  ;;  %vm531_vm4 = vcmp.eq.s32.totalorder %v3019_v3, %v3007_v58  ;;  %vm519_vm5 = vcmp.eq.s32.totalorder %v3019_v3, %v3014_v60  ;;  %v3260_v36 = vsel %vm311_vm0, 1, %v4764_v22  ;;  %v3263_v42 = vsel %vm312_vm1, 1, %v4764_v22 }
 0x121   : > { %vm637_vm6 = vcmp.eq.s32.totalorder %v3019_v3, %v595_v27  ;;  %vm638_vm7 = vcmp.eq.s32.totalorder %v3032_v17, %v595_v27  ;;  %v439_v27 = vsel %vm407_vm10, 1, %v4764_v22  ;;  %vm741_vm10 = vcmp.eq.s32.totalorder %v3019_v3, %v3095_v14 }
 0x122   : > { %v669_v56 = vsel %vm637_vm6, 1, %v4764_v22  ;;  %v670_v52 = vsel %vm638_vm7, 1, %v4764_v22  ;;  %2499 = vset.pattern.permute.xlu2 %v4755_v21  ;;  %2498 = vset.pattern.permute.xlu1 %v4756_v59  ;;  %v3210_v1 = vpop.permute.xlu2 %1033  ;;  %vm520_vm6 = vcmp.eq.s32.totalorder %v3032_v17, %v3014_v60  ;;  %vm532_vm7 = vcmp.eq.s32.totalorder %v3032_v17, %v3007_v58 }
 0x123   : > { %v3202_v63 = vadd.s32 %v669_v56, %v557_v13  ;;  %v3204_v16 = vadd.s32 %v670_v52, %v558_v53  ;;  %v3208_v23 = vpop.permute.xlu0 %1039  ;;  %1048 = vperm.xlu2 %2499, %v2832_v9   ;;  %939 = vperm.xlu1 %2498, %v2829_v8   ;;  %v327_v9 = vsel %vm295_vm8, 1, %v4764_v22  ;;  %v1144_v56 = vadd.s32 %v440_v26, %v328_v31 }
 0x124   : > { %1552 = vmatpush.bf16.msra.mxu0 %v2375_v54  ;;  %1601 = vmatpush.bf16.msra.mxu1 %v2383_v41  ;;  %v1143_v53 = vadd.s32 %v439_v27, %v327_v9  ;;  %v3266_v52 = vsel %vm423_vm2, 1, %v4764_v22  ;;  %v3271_v54 = vsel %vm424_vm3, 1, %v4764_v22  ;;  %v3273_v41 = vadd.s32 %v451_v29, %v339_v18 }
 0x125   : > { %4765 = vst [vmem:[#allocation27_spill] sm:$0xff] %v3202_v63  ;;  %v3275_v9 = vadd.s32 %v452_v49, %v340_v28  ;;  %v563_v26 = vsel %vm531_vm4, 1, %v4764_v22  ;;  %v551_v60 = vsel %vm519_vm5, 1, %v4764_v22  ;;  %v552_v18 = vsel %vm520_vm6, 1, %v4764_v22 }
 0x126   : > { %4766 = vst [vmem:[#allocation28_spill] sm:$0xff] %v3204_v16  ;;  %vm742_vm11 = vcmp.eq.s32.totalorder %v3032_v17, %v3095_v14  ;;  %vm967_vm12 = vcmp.eq.s32.totalorder %v3019_v3, %v3117_v44  ;;  %vm535_vm13 = vcmp.eq.s32.totalorder %v3019_v3, %v3071_v37  ;;  %vm536_vm14 = vcmp.eq.s32.totalorder %v3032_v17, %v3071_v37 }
 0x127   : > { %vm1079_vm15 = vcmp.eq.s32.totalorder %v3019_v3, %v3210_v1  ;;  %vm968_vm0 = vcmp.eq.s32.totalorder %v3032_v17, %v3117_v44  ;;  %vm853_vm1 = vcmp.eq.s32.totalorder %v3019_v3, %v3119_v10  ;;  %v773_v58 = vsel %vm741_vm10, 1, %v4764_v22 }
 0x128   : > { %vm1080_vm2 = vcmp.eq.s32.totalorder %v3032_v17, %v3210_v1  ;;  %vm854_vm3 = vcmp.eq.s32.totalorder %v3032_v17, %v3119_v10  ;;  %v1111_v44 = vsel %vm1079_vm15, 1, %v4764_v22  ;;  %vm965_vm10 = vcmp.eq.s32.totalorder %v3019_v3, %v3169_v47 }
 0x129   : > { %v3253_v13 = vpop.permute.xlu1 %697  ;;  %v886_v62 = vsel %vm854_vm3, 1, %v4764_v22  ;;  %v1160_v38 = vadd.s32 %v3271_v54, %v3263_v42  ;;  %vm412_vm3 = vcmp.eq.s32.totalorder %v3032_v17, %v2962_v46 }
 0x12a   : > { %vm743_vm6 = vcmp.eq.s32.totalorder %v3019_v3, %v3253_v13 }
 0x12b   : > { %2501 = vset.pattern.permute.xlu2 %v4754_v6  ;;  %2500 = vset.pattern.permute.xlu1 %v4755_v21  ;;  %v3281_v27 = vpop.permute.xlu2 %703  ;;  %v775_v24 = vsel %vm743_vm6, 1, %v4764_v22 }
 0x12c   : > { %v586_v31 = vpop.permute.xlu0 %585  ;;  %606 = vperm.xlu2 %2501, %v2826_v7   ;;  %1051 = vperm.xlu1 %2500, %v2829_v8  }
 0x12d   : > { %vm631_vm8 = vcmp.eq.s32.totalorder %v3019_v3, %v586_v31  ;;  %vm632_vm9 = vcmp.eq.s32.totalorder %v3032_v17, %v586_v31  ;;  %v564_v31 = vsel %vm532_vm7, 1, %v4764_v22  ;;  %vm744_vm7 = vcmp.eq.s32.totalorder %v3032_v17, %v3253_v13 }
 0x12e   : > { %v663_v28 = vsel %vm631_vm8, 1, %v4764_v22  ;;  %v664_v29 = vsel %vm632_vm9, 1, %v4764_v22  ;;  %v776_v10 = vsel %vm744_vm7, 1, %v4764_v22  ;;  %v1159_v13 = vadd.s32 %v3266_v52, %v3260_v36 }
 0x12f   : > { %v1175_v8 = vadd.s32 %v663_v28, %v551_v60  ;;  %v1176_v49 = vadd.s32 %v664_v29, %v552_v18  ;;  %v774_v18 = vsel %vm742_vm11, 1, %v4764_v22  ;;  %v999_v28 = vsel %vm967_vm12, 1, %v4764_v22 }
 0x130   : > { %v1239_v57 = vadd.s32 %v1111_v44, %v999_v28  ;;  %vm966_vm11 = vcmp.eq.s32.totalorder %v3032_v17, %v3169_v47  ;;  %v997_v36 = vsel %vm965_vm10, 1, %v4764_v22 }
 0x131   : > { %v3312_v14 = vadd.s32 %v1175_v8, %v1143_v53  ;;  %v3314_v60 = vadd.s32 %v1176_v49, %v1144_v56  ;;  %v1000_v53 = vsel %vm968_vm0, 1, %v4764_v22  ;;  %v885_v56 = vsel %vm853_vm1, 1, %v4764_v22 }
 0x132   : > { %v810_v29 = vpop.permute.xlu1 %809  ;;  %v1112_v8 = vsel %vm1080_vm2, 1, %v4764_v22  ;;  %v1205_v47 = vadd.s32 %v885_v56, %v773_v58  ;;  %v998_v52 = vsel %vm966_vm11, 1, %v4764_v22  ;;  %vm300_vm1 = vcmp.eq.s32.totalorder %v3032_v17, %v2906_v25 }
 0x133   : > { %vm855_vm4 = vcmp.eq.s32.totalorder %v3019_v3, %v810_v29  ;;  %vm856_vm5 = vcmp.eq.s32.totalorder %v3032_v17, %v810_v29  ;;  %vm411_vm2 = vcmp.eq.s32.totalorder %v3019_v3, %v2962_v46 }
 0x134   : > { %v604_v1 = vpop.permute.xlu0 %603  ;;  %v887_v49 = vsel %vm855_vm4, 1, %v4764_v22  ;;  %v888_v34 = vsel %vm856_vm5, 1, %v4764_v22  ;;  %2504 = vset.pattern.permute.xlu2 %v4762_v4  ;;  %2503 = vset.pattern.permute.xlu1 %v4762_v4  ;;  %v3338_v29 = vpop.permute.xlu2 %924  ;;  %vm857_vm4 = vcmp.eq.s32.totalorder %v3019_v3, %v3167_v33  ;;  %vm858_vm5 = vcmp.eq.s32.totalorder %v3032_v17, %v3167_v33 }
 0x135   : > { %vm643_vm8 = vcmp.eq.s32.totalorder %v3019_v3, %v604_v1  ;;  %vm644_vm9 = vcmp.eq.s32.totalorder %v3032_v17, %v604_v1  ;;  %721 = vperm.xlu2 %2504, %v2844_v12   ;;  %718 = vperm.xlu1 %2503, %v2826_v7   ;;  %v1240_v1 = vadd.s32 %v1112_v8, %v1000_v53  ;;  %v889_v33 = vsel %vm857_vm4, 1, %v4764_v22 }
 0x136   : > { %v675_v16 = vsel %vm643_vm8, 1, %v4764_v22  ;;  %v676_v28 = vsel %vm644_vm9, 1, %v4764_v22  ;;  %v1207_v63 = vadd.s32 %v887_v49, %v775_v24  ;;  %v1208_v50 = vadd.s32 %v888_v34, %v776_v10 }
 0x137   : > { %v1187_v44 = vadd.s32 %v675_v16, %v563_v26  ;;  %v1188_v5 = vadd.s32 %v676_v28, %v564_v31  ;;  %v567_v34 = vsel %vm535_vm13, 1, %v4764_v22  ;;  %v568_v24 = vsel %vm536_vm14, 1, %v4764_v22 }
 0x138   : > { %v1303_v42 = vadd.s32 %v1239_v57, %v1207_v63  ;;  %v1304_v54 = vadd.s32 %v1240_v1, %v1208_v50  ;;  %vm299_vm14 = vcmp.eq.s32.totalorder %v3019_v3, %v2906_v25  ;;  %vm969_vm6 = vcmp.eq.s32.totalorder %v3019_v3, %v3338_v29 }
 0x139   : > { %v3362_v43 = vadd.s32 %v1187_v44, %v3273_v41  ;;  %v3369_v16 = vadd.s32 %v1188_v5, %v3275_v9  ;;  %v1206_v41 = vadd.s32 %v886_v62, %v774_v18  ;;  %vm970_vm8 = vcmp.eq.s32.totalorder %v3032_v17, %v3338_v29 }
 0x13a   : > { %v1335_v28 = vadd.s32 %v1303_v42, %v3312_v14  ;;  %v1336_v1 = vadd.s32 %v1304_v54, %v3314_v60  ;;  %v331_v14 = vsel %vm299_vm14, 1, %v4764_v22  ;;  %v332_v60 = vsel %vm300_vm1, 1, %v4764_v22 }
 0x13b   : > { %v1031_v5 = vpop.permute.xlu1 %1030  ;;  %v890_v29 = vsel %vm858_vm5, 1, %v4764_v22  ;;  %v1001_v42 = vsel %vm969_vm6, 1, %v4764_v22  ;;  %vm1083_vm14 = vcmp.eq.s32.totalorder %v3019_v3, %v3208_v23  ;;  %vm1084_vm1 = vcmp.eq.s32.totalorder %v3032_v17, %v3208_v23 }
 0x13c   : > { %v610_v9 = vpop.permute.xlu0 %609  ;;  %vm1077_vm12 = vcmp.eq.s32.totalorder %v3019_v3, %v1031_v5  ;;  %vm1078_vm15 = vcmp.eq.s32.totalorder %v3032_v17, %v1031_v5  ;;  %v1002_v5 = vsel %vm970_vm8, 1, %v4764_v22  ;;  %vm748_vm4 = vcmp.eq.s32.totalorder %v3032_v17, %v3281_v27 }
 0x13d   : > { %vm647_vm13 = vcmp.eq.s32.totalorder %v3019_v3, %v610_v9  ;;  %vm648_vm0 = vcmp.eq.s32.totalorder %v3032_v17, %v610_v9  ;;  %v1109_v37 = vsel %vm1077_vm12, 1, %v4764_v22  ;;  %v1110_v62 = vsel %vm1078_vm15, 1, %v4764_v22  ;;  %2506 = vset.pattern.permute.xlu2 %v4763_v30  ;;  %2505 = vset.pattern.permute.xlu1 %v4763_v30 }
 0x13e   : > { %v679_v26 = vsel %vm647_vm13, 1, %v4764_v22  ;;  %v680_v31 = vsel %vm648_vm0, 1, %v4764_v22  ;;  %v1237_v50 = vadd.s32 %v1109_v37, %v997_v36  ;;  %v1238_v57 = vadd.s32 %v1110_v62, %v998_v52  ;;  %833 = vperm.xlu2 %2506, %v2844_v12   ;;  %v1037_v18 = vpop.permute.xlu2 %1036  ;;  %830 = vperm.xlu1 %2505, %v2826_v7  }
 0x13f   : > { %v1191_v63 = vadd.s32 %v679_v26, %v567_v34  ;;  %v1192_v58 = vadd.s32 %v680_v31, %v568_v24  ;;  %vm1081_vm7 = vcmp.eq.s32.totalorder %v3019_v3, %v1037_v18  ;;  %vm1082_vm9 = vcmp.eq.s32.totalorder %v3032_v17, %v1037_v18 }
 0x140   : > { %v1301_v53 = vadd.s32 %v1237_v50, %v1205_v47  ;;  %v1302_v56 = vadd.s32 %v1238_v57, %v1206_v41  ;;  %v1367_v47 = vcvt.s32.f32 %v1335_v28  ;;  %vm523_vm12 = vcmp.eq.s32.totalorder %v3019_v3, %v3025_v2 }
 0x141   : > { %v3393_v8 = vadd.s32 %v1191_v63, %v1159_v13  ;;  %v3395_v49 = vadd.s32 %v1192_v58, %v1160_v38  ;;  %v1368_v13 = vcvt.s32.f32 %v1336_v1  ;;  %vm524_vm15 = vcmp.eq.s32.totalorder %v3032_v17, %v3025_v2 }
 0x142   : > { %v1333_v10 = vadd.s32 %v1301_v53, %v3063_v45  ;;  %v1334_v44 = vadd.s32 %v1302_v56, %v3065_v40  ;;  %vm635_vm13 = vcmp.eq.s32.totalorder %v3019_v3, %v3073_v51  ;;  %vm636_vm0 = vcmp.eq.s32.totalorder %v3032_v17, %v3073_v51 }
 0x143   : > { %v1113_v54 = vsel %vm1081_vm7, 1, %v4764_v22  ;;  %v1114_v9 = vsel %vm1082_vm9, 1, %v4764_v22  ;;  %v667_v26 = vsel %vm635_vm13, 1, %v4764_v22  ;;  %v668_v31 = vsel %vm636_vm0, 1, %v4764_v22 }
 0x144   : > { %v701_v34 = vpop.permute.xlu1 %700  ;;  %v1365_v24 = vcvt.s32.f32 %v1333_v10  ;;  %v1366_v36 = vcvt.s32.f32 %v1334_v44  ;;  %v1242_v50 = vadd.s32 %v1114_v9, %v1002_v5  ;;  %v444_v58 = vsel %vm412_vm3, 1, %v4764_v22 }
 0x145   : > { %v3401_v52 = vpop.permute.xlu0 %930  ;;  %vm745_vm10 = vcmp.eq.s32.totalorder %v3019_v3, %v701_v34  ;;  %vm746_vm11 = vcmp.eq.s32.totalorder %v3032_v17, %v701_v34  ;;  %v555_v18 = vsel %vm523_vm12, 1, %v4764_v22  ;;  %v556_v53 = vsel %vm524_vm15, 1, %v4764_v22 }
 0x146   : > { %2508 = vset.pattern.permute.xlu2 %v4755_v21  ;;  %2507 = vset.pattern.permute.xlu1 %v4756_v59  ;;  %v1397_v40 = vpack.c.bf16 %v1367_v47, %v1365_v24  ;;  %v1398_v45 = vpack.c.bf16 %v1368_v13, %v1366_v36  ;;  %v777_v37 = vsel %vm745_vm10, 1, %v4764_v22  ;;  %v778_v62 = vsel %vm746_vm11, 1, %v4764_v22 }
 0x147   : > { %1054 = vperm.xlu2 %2508, %v2826_v7   ;;  %v3408_v38 = vpop.permute.xlu2 %709  ;;  %945 = vperm.xlu1 %2507, %v2844_v12   ;;  %v443_v7 = vsel %vm411_vm2, 1, %v4764_v22  ;;  %vm747_vm2 = vcmp.eq.s32.totalorder %v3019_v3, %v3281_v27  ;;  %v1209_v57 = vadd.s32 %v889_v33, %v777_v37  ;;  %v1210_v63 = vadd.s32 %v890_v29, %v778_v62  ;;  %v3504_v33 = vld [vmem:[%s2799_s9 + $0x58] sm:$0xff] }
 0x148   : > { %1553 = vmatmul.bf16.vlgmr.msra.gmra.mxu0 %v1397_v40  ;;  %1602 = vmatmul.bf16.vlgmr.msra.gmra.mxu1 %v1398_v45  ;;  %v1179_v56 = vadd.s32 %v667_v26, %v555_v18  ;;  %v1180_v10 = vadd.s32 %v668_v31, %v556_v53  ;;  %v779_v28 = vsel %vm747_vm2, 1, %v4764_v22  ;;  %v1115_v46 = vsel %vm1083_vm14, 1, %v4764_v22 }
 0x149   : > { %v1116_v34 = vsel %vm1084_vm1, 1, %v4764_v22  ;;  %v780_v2 = vsel %vm748_vm4, 1, %v4764_v22  ;;  %v1306_v13 = vadd.s32 %v1242_v50, %v1210_v63  ;;  %v1148_v40 = vadd.s32 %v444_v58, %v332_v60 }
 0x14a   : > { %vm305_vm8 = vcmp.eq.s32.totalorder %v3019_v3, %v2923_v32  ;;  %vm306_vm9 = vcmp.eq.s32.totalorder %v3032_v17, %v2923_v32  ;;  %vm417_vm10 = vcmp.eq.s32.totalorder %v3019_v3, %v2940_v39  ;;  %vm418_vm11 = vcmp.eq.s32.totalorder %v3032_v17, %v2940_v39 }
 0x14b   : > { %v1276_v60 = vadd.s32 %v1180_v10, %v1148_v40  ;;  %v1338_v62 = vadd.s32 %v1306_v13, %v3175_v0  ;;  %vm529_vm12 = vcmp.eq.s32.totalorder %v3019_v3, %v3055_v15  ;;  %vm530_vm15 = vcmp.eq.s32.totalorder %v3032_v17, %v3055_v15 }
 0x14c   : > { %v338_v39 = vsel %vm306_vm9, 1, %v4764_v22  ;;  %v449_v18 = vsel %vm417_vm10, 1, %v4764_v22  ;;  %v450_v53 = vsel %vm418_vm11, 1, %v4764_v22  ;;  %vm301_vm13 = vcmp.eq.s32.totalorder %v3019_v3, %v2883_v19 }
 0x14d   : > { %v816_v25 = vpop.permute.xlu1 %815  ;;  %v3432_v41 = vpop.permute.xlu0 %936  ;;  %v561_v10 = vsel %vm529_vm12, 1, %v4764_v22  ;;  %vm413_vm1 = vcmp.eq.s32.totalorder %v3019_v3, %v2930_v35  ;;  %vm414_vm2 = vcmp.eq.s32.totalorder %v3032_v17, %v2930_v35  ;;  %vm302_vm4 = vcmp.eq.s32.totalorder %v3032_v17, %v2883_v19 }
 0x14e   : > { %vm859_vm5 = vcmp.eq.s32.totalorder %v3019_v3, %v816_v25  ;;  %vm860_vm6 = vcmp.eq.s32.totalorder %v3032_v17, %v816_v25  ;;  %v333_v40 = vsel %vm301_vm13, 1, %v4764_v22  ;;  %v445_v35 = vsel %vm413_vm1, 1, %v4764_v22 }
 0x14f   : > { %2510 = vset.pattern.permute.xlu2 %v4754_v6  ;;  %2509 = vset.pattern.permute.xlu1 %v4755_v21  ;;  %v891_v44 = vsel %vm859_vm5, 1, %v4764_v22  ;;  %v892_v24 = vsel %vm860_vm6, 1, %v4764_v22  ;;  %vm303_vm5 = vcmp.eq.s32.totalorder %v3019_v3, %v2888_v20  ;;  %vm415_vm6 = vcmp.eq.s32.totalorder %v3019_v3, %v2971_v48 }
 0x150   : > { %612 = vperm.xlu2 %2510, %v2841_v11   ;;  %v3453_v51 = vpop.permute.xlu2 %821  ;;  %1057 = vperm.xlu1 %2509, %v2844_v12   ;;  %v1241_v11 = vadd.s32 %v1113_v54, %v1001_v42  ;;  %v1147_v12 = vadd.s32 %v443_v7, %v331_v14  ;;  %v1211_v45 = vadd.s32 %v891_v44, %v779_v28  ;;  %v3510_v54 = vld [vmem:[%s2799_s9 + $0x50] sm:$0xff]  ;;  %v562_v28 = vsel %vm530_vm15, 1, %v4764_v22 }
 0x151   : > { %v1212_v27 = vadd.s32 %v892_v24, %v780_v2  ;;  %v1154_v2 = vadd.s32 %v450_v53, %v338_v39  ;;  %v446_v19 = vsel %vm414_vm2, 1, %v4764_v22  ;;  %vm432_vm12 = vcmp.eq.s32.totalorder %v3032_v17, %v2996_v55 }
 0x152   : > { %v1305_v47 = vadd.s32 %v1241_v11, %v1209_v57  ;;  %v1275_v42 = vadd.s32 %v1179_v56, %v1147_v12  ;;  %v1370_v57 = vcvt.s32.f32 %v1338_v62  ;;  %v337_v12 = vsel %vm305_vm8, 1, %v4764_v22 }
 0x153   : > { %vm304_vm8 = vcmp.eq.s32.totalorder %v3032_v17, %v2888_v20  ;;  %vm973_vm15 = vcmp.eq.s32.totalorder %v3019_v3, %v3401_v52  ;;  %vm974_vm13 = vcmp.eq.s32.totalorder %v3032_v17, %v3401_v52 }
 0x154   : > { %v1337_v37 = vadd.s32 %v1305_v47, %v3173_v61 }
 0x155   : > { %v3482_v1 = vpop.permute.xlu0 %942 }
 0x156   : > { %v928_v36 = vpop.permute.xlu1 %927  ;;  %v1369_v61 = vcvt.s32.f32 %v1337_v37 }
 0x157   : > { %vm971_vm3 = vcmp.eq.s32.totalorder %v3019_v3, %v928_v36  ;;  %vm972_vm7 = vcmp.eq.s32.totalorder %v3032_v17, %v928_v36 }
 0x158   : > { %v1003_v23 = vsel %vm971_vm3, 1, %v4764_v22  ;;  %v1004_v14 = vsel %vm972_vm7, 1, %v4764_v22  ;;  %2512 = vset.pattern.permute.xlu2 %v4762_v4  ;;  %2511 = vset.pattern.permute.xlu1 %v4762_v4  ;;  %vm416_vm3 = vcmp.eq.s32.totalorder %v3032_v17, %v2971_v48  ;;  %vm431_vm7 = vcmp.eq.s32.totalorder %v3019_v3, %v2996_v55 }
 0x159   : > { %v1243_v7 = vadd.s32 %v1115_v46, %v1003_v23  ;;  %v1244_v25 = vadd.s32 %v1116_v34, %v1004_v14  ;;  %727 = vperm.xlu2 %2512, %v3504_v33   ;;  %v3507_v29 = vpop.permute.xlu2 %1042  ;;  %724 = vperm.xlu1 %2511, %v3510_v54   ;;  %v1153_v34 = vadd.s32 %v449_v18, %v337_v12  ;;  %v4767_v23 = vld [vmem:[#allocation9_spill] sm:$0xff]  ;;  %v334_v14 = vsel %vm302_vm4, 1, %v4764_v22 }
 0x15a   : > { %vm319_vm9 = vcmp.eq.s32.totalorder %v3019_v3, %v4767_v23  ;;  %vm320_vm10 = vcmp.eq.s32.totalorder %v3032_v17, %v4767_v23  ;;  %v1150_v37 = vadd.s32 %v446_v19, %v334_v14  ;;  %v464_v55 = vsel %vm432_vm12, 1, %v4764_v22  ;;  %v4770_v12 = vld [vmem:[#allocation13_spill] sm:$0xff] }
 0x15b   : > { %v1307_v5 = vadd.s32 %v1243_v7, %v1211_v45  ;;  %v1308_v9 = vadd.s32 %v1244_v25, %v1212_v27  ;;  %v4768_v27 = vld [vmem:[#allocation11_spill] sm:$0xff]  ;;  %v335_v25 = vsel %vm303_vm5, 1, %v4764_v22  ;;  %v351_v48 = vsel %vm319_vm9, 1, %v4764_v22 }
 0x15c   : > { %vm323_vm11 = vcmp.eq.s32.totalorder %v3019_v3, %v4768_v27  ;;  %v352_v62 = vsel %vm320_vm10, 1, %v4764_v22  ;;  %vm435_vm9 = vcmp.eq.s32.totalorder %v3019_v3, %v4770_v12  ;;  %vm436_vm10 = vcmp.eq.s32.totalorder %v3032_v17, %v4770_v12 }
 0x15d   : > { %v3515_v26 = vpop.permute.xlu0 %948  ;;  %v1339_v31 = vadd.s32 %v1307_v5, %v1275_v42  ;;  %v1340_v11 = vadd.s32 %v1308_v9, %v1276_v60  ;;  %v447_v42 = vsel %vm415_vm6, 1, %v4764_v22  ;;  %v448_v60 = vsel %vm416_vm3, 1, %v4764_v22 }
 0x15e   : > { %v336_v5 = vsel %vm304_vm8, 1, %v4764_v22  ;;  %v1149_v9 = vadd.s32 %v445_v35, %v333_v40  ;;  %v3629_v20 = vadd.s32 %v447_v42, %v335_v25  ;;  %vm324_vm6 = vcmp.eq.s32.totalorder %v3032_v17, %v4768_v27 }
 0x15f   : > { %v3525_v50 = vpop.permute.xlu1 %706  ;;  %v1371_v0 = vcvt.s32.f32 %v1339_v31  ;;  %v1372_v63 = vcvt.s32.f32 %v1340_v11  ;;  %v3622_v31 = vsel %vm323_vm11, 1, %v4764_v22  ;;  %vm751_vm3 = vcmp.eq.s32.totalorder %v3019_v3, %v3408_v38 }
 0x160   : > { %vm750_vm8 = vcmp.eq.s32.totalorder %v3032_v17, %v3525_v50  ;;  %vm863_vm11 = vcmp.eq.s32.totalorder %v3019_v3, %v3453_v51  ;;  %v468_v27 = vsel %vm436_vm10, 1, %v4764_v22 }
 0x161   : > { %2514 = vset.pattern.permute.xlu2 %v4763_v30  ;;  %v1399_v32 = vpack.c.bf16 %v1371_v0, %v1369_v61  ;;  %v1400_v58 = vpack.c.bf16 %v1372_v63, %v1370_v57  ;;  %2513 = vset.pattern.permute.xlu1 %v4763_v30  ;;  %v3631_v61 = vadd.s32 %v448_v60, %v336_v5  ;;  %v4769_v63 = vld [vmem:[#allocation19_spill] sm:$0xff]  ;;  %v782_v40 = vsel %vm750_vm8, 1, %v4764_v22 }
 0x162   : > { %839 = vperm.xlu2 %2514, %v3504_v33   ;;  %v601_v56 = vpop.permute.xlu2 %600  ;;  %836 = vperm.xlu1 %2513, %v3510_v54   ;;  %v1168_v57 = vadd.s32 %v464_v55, %v352_v62  ;;  %vm543_vm4 = vcmp.eq.s32.totalorder %v3019_v3, %v4769_v63  ;;  %vm544_vm5 = vcmp.eq.s32.totalorder %v3032_v17, %v4769_v63 }
 0x163   : > { %vm641_vm0 = vcmp.eq.s32.totalorder %v3019_v3, %v601_v56  ;;  %vm642_vm14 = vcmp.eq.s32.totalorder %v3032_v17, %v601_v56  ;;  %1558 = vmatmul.bf16.gmra.mxu0 %v1399_v32  ;;  %1607 = vmatmul.bf16.gmra.mxu1 %v1400_v58  ;;  %v1005_v32 = vsel %vm973_vm15, 1, %v4764_v22  ;;  %v1006_v58 = vsel %vm974_vm13, 1, %v4764_v22 }
 0x164   : > { %v673_v44 = vsel %vm641_vm0, 1, %v4764_v22  ;;  %v674_v46 = vsel %vm642_vm14, 1, %v4764_v22  ;;  %vm1085_vm0 = vcmp.eq.s32.totalorder %v3019_v3, %v3507_v29  ;;  %vm1086_vm14 = vcmp.eq.s32.totalorder %v3032_v17, %v3507_v29 }
 0x165   : > { %v1185_v24 = vadd.s32 %v673_v44, %v561_v10  ;;  %v1186_v36 = vadd.s32 %v674_v46, %v562_v28  ;;  %v3553_v47 = vpop.permute.xlu0 %954  ;;  %v1117_v39 = vsel %vm1085_vm0, 1, %v4764_v22  ;;  %v1118_v18 = vsel %vm1086_vm14, 1, %v4764_v22  ;;  %v4771_v28 = vld [vmem:[#allocation27_spill] sm:$0xff]  ;;  %v3687_v46 = vld [vmem:[%s2799_s9 + $0x60] sm:$0xff] }
 0x166   : > { %v575_v10 = vsel %vm543_vm4, 1, %v4764_v22  ;;  %v576_v29 = vsel %vm544_vm5, 1, %v4764_v22  ;;  %v1277_v44 = vadd.s32 %v4771_v28, %v1149_v9  ;;  %vm752_vm13 = vcmp.eq.s32.totalorder %v3032_v17, %v3408_v38  ;;  %v4774_v28 = vld [vmem:[#allocation24_spill] sm:$0xff] }
 0x167   : > { %v3559_v13 = vadd.s32 %v1185_v24, %v1153_v34  ;;  %v3561_v15 = vadd.s32 %v1186_v36, %v1154_v2  ;;  %v4772_v2 = vld [vmem:[#allocation26_spill] sm:$0xff]  ;;  %v783_v24 = vsel %vm751_vm3, 1, %v4764_v22  ;;  %v1246_v35 = vadd.s32 %v1118_v18, %v1006_v58 }
 0x168   : > { %v819_v45 = vpop.permute.xlu1 %818  ;;  %vm547_vm12 = vcmp.eq.s32.totalorder %v3019_v3, %v4772_v2  ;;  %vm548_vm15 = vcmp.eq.s32.totalorder %v3032_v17, %v4772_v2  ;;  %vm864_vm0 = vcmp.eq.s32.totalorder %v3032_v17, %v3453_v51  ;;  %v895_v38 = vsel %vm863_vm11, 1, %v4764_v22 }
 0x169   : > { %vm861_vm1 = vcmp.eq.s32.totalorder %v3019_v3, %v819_v45  ;;  %vm862_vm2 = vcmp.eq.s32.totalorder %v3032_v17, %v819_v45  ;;  %v1245_v45 = vadd.s32 %v1117_v39, %v1005_v32  ;;  %v896_v51 = vsel %vm864_vm0, 1, %v4764_v22 }
 0x16a   : > { %2516 = vset.pattern.permute.xlu2 %v4755_v21  ;;  %2515 = vset.pattern.permute.xlu1 %v4756_v59  ;;  %v893_v53 = vsel %vm861_vm1, 1, %v4764_v22  ;;  %v894_v56 = vsel %vm862_vm2, 1, %v4764_v22  ;;  %v1215_v9 = vadd.s32 %v895_v38, %v783_v24  ;;  %v1279_v24 = vadd.s32 %v4774_v28, %v3629_v20 }
 0x16b   : > { %1060 = vperm.xlu2 %2516, %v3510_v54   ;;  %v3593_v7 = vpop.permute.xlu2 %715  ;;  %v463_v54 = vsel %vm431_vm7, 1, %v4764_v22  ;;  %951 = vperm.xlu1 %2515, %v3504_v33   ;;  %vm749_vm7 = vcmp.eq.s32.totalorder %v3019_v3, %v3525_v50  ;;  %v1214_v23 = vadd.s32 %v894_v56, %v782_v40  ;;  %v4773_v50 = vld [vmem:[#allocation28_spill] sm:$0xff]  ;;  %v3743_v56 = vld [vmem:[%s2799_s9 + $0x68] sm:$0xff]  ;;  %v579_v38 = vsel %vm547_vm12, 1, %v4764_v22 }
 0x16c   : > { %v1167_v0 = vadd.s32 %v463_v54, %v351_v48  ;;  %v781_v36 = vsel %vm749_vm7, 1, %v4764_v22  ;;  %v1278_v25 = vadd.s32 %v4773_v50, %v1150_v37  ;;  %v580_v20 = vsel %vm548_vm15, 1, %v4764_v22 }
 0x16d   : > { %v1213_v19 = vadd.s32 %v893_v53, %v781_v36  ;;  %v1310_v62 = vadd.s32 %v1246_v35, %v1214_v23  ;;  %v4775_v36 = vld [vmem:[#allocation25_spill] sm:$0xff]  ;;  %vm977_vm8 = vcmp.eq.s32.totalorder %v3019_v3, %v3432_v41 }
 0x16e   : > { %v3627_v11 = vpop.permute.xlu0 %615  ;;  %v1280_v40 = vadd.s32 %v4775_v36, %v3631_v61  ;;  %v3823_v36 = vld [vmem:[%s2799_s9 + $0x70] sm:$0xff] }
 0x16f   : > { %v1309_v48 = vadd.s32 %v1245_v45, %v1213_v19 }
 0x171   : > { %v934_v52 = vpop.permute.xlu1 %933  ;;  %v1341_v23 = vadd.s32 %v1309_v48, %v1277_v44 }
 0x172   : > { %vm975_vm2 = vcmp.eq.s32.totalorder %v3019_v3, %v934_v52  ;;  %vm976_vm4 = vcmp.eq.s32.totalorder %v3032_v17, %v934_v52 }
 0x173   : > { %2518 = vset.pattern.permute.xlu2 %v4754_v6  ;;  %2517 = vset.pattern.permute.xlu1 %v4755_v21  ;;  %v1007_v32 = vsel %vm975_vm2, 1, %v4764_v22  ;;  %v1008_v52 = vsel %vm976_vm4, 1, %v4764_v22  ;;  %vm756_vm2 = vcmp.eq.s32.totalorder %v3032_v17, %v3593_v7 }
 0x174   : > { %618 = vperm.xlu2 %2518, %v3687_v46   ;;  %v3690_v34 = vpop.permute.xlu2 %827  ;;  %1063 = vperm.xlu1 %2517, %v3504_v33   ;;  %v784_v33 = vsel %vm752_vm13, 1, %v4764_v22 }
 0x175   : > { %vm868_vm4 = vcmp.eq.s32.totalorder %v3032_v17, %v3690_v34 }
 0x176   : > { %v622_v14 = vpop.permute.xlu0 %621 }
 0x177   : > { %vm655_vm14 = vcmp.eq.s32.totalorder %v3019_v3, %v622_v14  ;;  %vm656_vm1 = vcmp.eq.s32.totalorder %v3032_v17, %v622_v14  ;;  %v1342_v14 = vadd.s32 %v1310_v62, %v1278_v25 }
 0x178   : > { %v687_v42 = vsel %vm655_vm14, 1, %v4764_v22  ;;  %v688_v60 = vsel %vm656_vm1, 1, %v4764_v22  ;;  %vm755_vm14 = vcmp.eq.s32.totalorder %v3019_v3, %v3593_v7  ;;  %vm867_vm1 = vcmp.eq.s32.totalorder %v3019_v3, %v3690_v34  ;;  %v2402_v7 = vld [vmem:[%s4700_s3 + $0x54] sm:$0xf0]  ;;  %v2401_v34 = vld [vmem:[%s4700_s3 + $0x54] sm:$0xf] }
 0x179   : > { %v1199_v54 = vadd.s32 %v687_v42, %v575_v10  ;;  %v1200_v5 = vadd.s32 %v688_v60, %v576_v29  ;;  %v467_v29 = vsel %vm435_vm9, 1, %v4764_v22  ;;  %v1374_v2 = vcvt.s32.f32 %v1342_v14 }
 0x17a   : > { %v1046_v55 = vpop.permute.xlu1 %1045  ;;  %v1171_v25 = vadd.s32 %v467_v29, %v3622_v31  ;;  %vm978_vm9 = vcmp.eq.s32.totalorder %v3032_v17, %v3432_v41  ;;  %v2363_v41 = vld [vmem:[%s4700_s3 + $0x70] sm:$0xf] }
 0x17b   : > { %v3726_v37 = vadd.s32 %v1199_v54, %v1167_v0  ;;  %v3728_v63 = vadd.s32 %v1200_v5, %v1168_v57  ;;  %vm1087_vm5 = vcmp.eq.s32.totalorder %v3019_v3, %v1046_v55  ;;  %vm1088_vm3 = vcmp.eq.s32.totalorder %v3032_v17, %v1046_v55 }
 0x17c   : > { %v1119_v58 = vsel %vm1087_vm5, 1, %v4764_v22  ;;  %v1120_v39 = vsel %vm1088_vm3, 1, %v4764_v22  ;;  %2520 = vset.pattern.permute.xlu2 %v4762_v4  ;;  %v356_v0 = vsel %vm324_vm6, 1, %v4764_v22  ;;  %v1216_v57 = vadd.s32 %v896_v51, %v784_v33  ;;  %2519 = vset.pattern.permute.xlu1 %v4762_v4 }
 0x17d   : > { %v1247_v18 = vadd.s32 %v1119_v58, %v1007_v32  ;;  %v1248_v53 = vadd.s32 %v1120_v39, %v1008_v52  ;;  %733 = vperm.xlu2 %2520, %v3743_v56   ;;  %v1049_v10 = vpop.permute.xlu2 %1048  ;;  %730 = vperm.xlu1 %2519, %v3687_v46   ;;  %v1172_v33 = vadd.s32 %v468_v27, %v356_v0  ;;  %v1373_v5 = vcvt.s32.f32 %v1341_v23 }
 0x17e   : > { %v628_v45 = vpop.permute.xlu0 %627  ;;  %vm1089_vm10 = vcmp.eq.s32.totalorder %v3019_v3, %v1049_v10  ;;  %vm1090_vm11 = vcmp.eq.s32.totalorder %v3032_v17, %v1049_v10  ;;  %v1010_v39 = vsel %vm978_vm9, 1, %v4764_v22 }
 0x17f   : > { %v1311_v35 = vadd.s32 %v1247_v18, %v1215_v9  ;;  %v1312_v19 = vadd.s32 %v1248_v53, %v1216_v57  ;;  %vm659_vm6 = vcmp.eq.s32.totalorder %v3019_v3, %v628_v45  ;;  %vm660_vm7 = vcmp.eq.s32.totalorder %v3032_v17, %v628_v45  ;;  %v2406_v18 = vld [vmem:[%s4700_s3 + $0x74] sm:$0xf0]  ;;  %v2405_v53 = vld [vmem:[%s4700_s3 + $0x74] sm:$0xf] }
 0x180   : > { %v691_v61 = vsel %vm659_vm6, 1, %v4764_v22  ;;  %v692_v12 = vsel %vm660_vm7, 1, %v4764_v22  ;;  %v1121_v0 = vsel %vm1089_vm10, 1, %v4764_v22  ;;  %v1122_v10 = vsel %vm1090_vm11, 1, %v4764_v22 }
 0x181   : > { %v1343_v44 = vadd.s32 %v1311_v35, %v1279_v24  ;;  %v1344_v50 = vadd.s32 %v1312_v19, %v1280_v40  ;;  %v1203_v42 = vadd.s32 %v691_v61, %v579_v38  ;;  %v1204_v60 = vadd.s32 %v692_v12, %v580_v20  ;;  %v2365_v24 = vld [vmem:[%s4700_s3 + $0x78] sm:$0xf0]  ;;  %v2355_v20 = vld [vmem:[%s4700_s3 + $0x60] sm:$0xf]  ;;  %v2404_v61 = vld [vmem:[%s4700_s3 + $0x64] sm:$0xf0] }
 0x182   : > { %v2364_v28 = vor.u32 %v2406_v18, %v2363_v41  ;;  %v1250_v23 = vadd.s32 %v1122_v10, %v1010_v39  ;;  %v787_v12 = vsel %vm755_vm14, 1, %v4764_v22 }
 0x183   : > { %v713_v54 = vpop.permute.xlu1 %712  ;;  %v1375_v51 = vcvt.s32.f32 %v1343_v44  ;;  %v1376_v9 = vcvt.s32.f32 %v1344_v50  ;;  %v3772_v48 = vadd.s32 %v1203_v42, %v1171_v25  ;;  %v3774_v62 = vadd.s32 %v1204_v60, %v1172_v33  ;;  %v2403_v50 = vld [vmem:[%s4700_s3 + $0x64] sm:$0xf]  ;;  %v2357_v25 = vld [vmem:[%s4700_s3 + $0x68] sm:$0xf0] }
 0x184   : > { %vm753_vm13 = vcmp.eq.s32.totalorder %v3019_v3, %v713_v54  ;;  %vm754_vm0 = vcmp.eq.s32.totalorder %v3032_v17, %v713_v54  ;;  %1769 = vmatpush.bf16.msra.mxu2 %v2364_v28  ;;  %v2356_v44 = vor.u32 %v2404_v61, %v2355_v20  ;;  %v2360_v33 = vor.u32 %v2403_v50, %v2357_v25  ;;  %v2339_v28 = vld [vmem:[%s4700_s3 + $0x40] sm:$0xf]  ;;  %v4777_v20 = vld [vmem:[#allocation15_spill] sm:$0xff] }
 0x185   : > { %2522 = vset.pattern.permute.xlu2 %v4763_v30  ;;  %v1401_v55 = vpack.c.bf16 %v1375_v51, %v1373_v5  ;;  %v1402_v32 = vpack.c.bf16 %v1376_v9, %v1374_v2  ;;  %2521 = vset.pattern.permute.xlu1 %v4763_v30  ;;  %v785_v45 = vsel %vm753_vm13, 1, %v4764_v22  ;;  %v786_v35 = vsel %vm754_vm0, 1, %v4764_v22  ;;  %v2347_v9 = vld [vmem:[%s4700_s3 + $0x50] sm:$0xf] }
 0x186   : > { %845 = vperm.xlu2 %2522, %v3743_v56   ;;  %v3779_v31 = vpop.permute.xlu2 %606  ;;  %842 = vperm.xlu1 %2521, %v3687_v46   ;;  %v788_v42 = vsel %vm756_vm2, 1, %v4764_v22  ;;  %v900_v60 = vsel %vm868_vm4, 1, %v4764_v22  ;;  %vm425_vm10 = vcmp.eq.s32.totalorder %v3019_v3, %v4777_v20  ;;  %vm426_vm11 = vcmp.eq.s32.totalorder %v3032_v17, %v4777_v20 }
 0x187   : > { %1563 = vmatmul.bf16.gmra.mxu0 %v1401_v55  ;;  %1612 = vmatmul.bf16.gmra.mxu1 %v1402_v32  ;;  %v2348_v32 = vor.u32 %v2402_v7, %v2347_v9  ;;  %v1220_v41 = vadd.s32 %v900_v60, %v788_v42  ;;  %v2397_v42 = vld [vmem:[%s4700_s3 + $0x34] sm:$0xf]  ;;  %v2333_v60 = vld [vmem:[%s4700_s3 + $0x38] sm:$0xf0] }
 0x188   : > { %1770 = vmatpush.bf16.msra.mxu2 %v2356_v44 }
 0x18c   : > { %v825_v52 = vpop.permute.xlu1 %824  ;;  %1771 = vmatpush.bf16.msra.mxu2 %v2348_v32  ;;  %v2323_v32 = vld [vmem:[%s4700_s3 + $0x20] sm:$0xf] }
 0x18d   : > { %vm865_vm12 = vcmp.eq.s32.totalorder %v3019_v3, %v825_v52  ;;  %vm866_vm15 = vcmp.eq.s32.totalorder %v3032_v17, %v825_v52  ;;  %v2349_v52 = vld [vmem:[%s4700_s3 + $0x58] sm:$0xf0] }
 0x18e   : > { %2525 = vset.pattern.permute.xlu2 %v4755_v21  ;;  %2524 = vset.pattern.permute.xlu1 %v4756_v59  ;;  %v897_v29 = vsel %vm865_vm12, 1, %v4764_v22  ;;  %v898_v27 = vsel %vm866_vm15, 1, %v4764_v22 }
 0x18f   : > { %1066 = vperm.xlu2 %2525, %v3687_v46   ;;  %v3785_v58 = vpop.permute.xlu2 %721  ;;  %957 = vperm.xlu1 %2524, %v3743_v56   ;;  %v1009_v46 = vsel %vm977_vm8, 1, %v4764_v22  ;;  %v1217_v14 = vadd.s32 %v897_v29, %v785_v45  ;;  %v1218_v38 = vadd.s32 %v898_v27, %v786_v35  ;;  %v3892_v29 = vld [vmem:[%s2799_s9 + $0x78] sm:$0xff]  ;;  %s2171_s9 = sshll.u32 %s2168_s7, 4  ;;  %s2172_s9 = int_to_ptr.hbm [resolvable:$true] %s2171_s9 }
 0x190   : > { %v1249_v19 = vadd.s32 %v1121_v0, %v1009_v46  ;;  %v4776_v27 = vld [vmem:[#allocation8_spill] sm:$0xff]  ;;  %s2654_s10 = sshra.s32 %s2172_s9, 4  ;;  %s2655_s10 = int_to_ptr.hbm [resolvable:$true] %s2654_s10 }
 0x191   : > { %v1314_v51 = vadd.s32 %v1250_v23, %v1218_v38  ;;  %vm313_vm8 = vcmp.eq.s32.totalorder %v3019_v3, %v4776_v27  ;;  %vm314_vm9 = vcmp.eq.s32.totalorder %v3032_v17, %v4776_v27  ;;  %v2341_v23 = vld [vmem:[%s4700_s3 + $0x48] sm:$0xf0]  ;;  %s2656_s11 = scalar_lea.hbm %s2655_s10, 256  ;;  %p2661_p0 = scmp.lt.s32.totalorder %s2655_s10, %s4702_s5 }
 0x192   : > { %v1313_v5 = vadd.s32 %v1249_v19, %v1217_v14  ;;  %p2657_p11 = scmp.ne.s32.totalorder %s2655_s10, %s2656_s11  ;;  %p2662_p1 = scmp.lt.s32.totalorder %s2660_s14, %s2656_s11 }
 0x193   : > { %v1346_v19 = vadd.s32 %v1314_v51, %v3561_v15  ;;  %v346_v15 = vsel %vm314_vm9, 1, %v4764_v22  ;;  %v4778_v51 = vld [vmem:[#allocation18_spill] sm:$0xff] }
 0x194   : > { %v1345_v35 = vadd.s32 %v1313_v5, %v3559_v13  ;;  %v345_v13 = vsel %vm313_vm8, 1, %v4764_v22  ;;  %v458_v5 = vsel %vm426_vm11, 1, %v4764_v22  ;;  %vm537_vm12 = vcmp.eq.s32.totalorder %v3019_v3, %v4778_v51  ;;  %p2658_p12 = pnand %p2657_p11, %p2782_p5  ;;  %p2663_p2 = por %p2662_p1, %p2661_p0 }
 0x195   : > { %v940_v57 = vpop.permute.xlu1 %939  ;;  %v1378_v25 = vcvt.s32.f32 %v1346_v19  ;;  %vm538_vm15 = vcmp.eq.s32.totalorder %v3032_v17, %v4778_v51  ;;  %v1162_v27 = vadd.s32 %v458_v5, %v346_v15  ;;  %v2392_v15 = vld [vmem:[%s4700_s3 + $0x4] sm:$0xf0]  ;;  %vm982_vm11 = vcmp.eq.s32.totalorder %v3032_v17, %v3482_v1 }
 0x196   : > { %vm979_vm5 = vcmp.eq.s32.totalorder %v3019_v3, %v940_v57  ;;  %vm980_vm3 = vcmp.eq.s32.totalorder %v3032_v17, %v940_v57  ;;  %v2352_v57 = vor.u32 %v2401_v34, %v2349_v52  ;;  %v1377_v44 = vcvt.s32.f32 %v1345_v35  ;;  %v2396_v52 = vld [vmem:[%s4700_s3 + $0x24] sm:$0xf0]  ;;  %v2393_v35 = vld [vmem:[%s4700_s3 + $0x14] sm:$0xf]  ;;  %p2659_p13 = pneg %p2658_p12 }
 0x197   : > { %2527 = vset.pattern.permute.xlu2 %v4754_v6  ;;  %2526 = vset.pattern.permute.xlu1 %v4755_v21  ;;  %v2368_v6 = vor.u32 %v2405_v53, %v2365_v24  ;;  %v1011_v55 = vsel %vm979_vm5, 1, %v4764_v22  ;;  %v1012_v46 = vsel %vm980_vm3, 1, %v4764_v22  ;;  %v2399_v24 = vld [vmem:[%s4700_s3 + $0x44] sm:$0xf]  ;;  %v2336_v34 = vor.u32 %v2397_v42, %v2333_v60 }
 0x198   : > { %624 = vperm.xlu2 %2527, %v3823_v36   ;;  %v3826_v40 = vpop.permute.xlu2 %833  ;;  %1069 = vperm.xlu1 %2526, %v3743_v56   ;;  %v899_v56 = vsel %vm867_vm1, 1, %v4764_v22  ;;  %v2344_v38 = vor.u32 %v2399_v24, %v2341_v23  ;;  %vm645_vm3 = vcmp.eq.s32.totalorder %v3019_v3, %v3779_v31  ;;  %p2664_p3 = pnand %p2663_p2, %p2659_p13 }
 0x199   : > { %1818 = vmatpush.bf16.msra.mxu3 %v2368_v6  ;;  %v1219_v54 = vadd.s32 %v899_v56, %v787_v12  ;;  %v2331_v56 = vld [vmem:[%s4700_s3 + $0x30] sm:$0xf] }
 0x19d   : > { %1819 = vmatpush.bf16.msra.mxu3 %v2360_v33 }
 0x19e   : > { %v1052_v2 = vpop.permute.xlu1 %1051 }
 0x19f   : > { %vm1091_vm6 = vcmp.eq.s32.totalorder %v3019_v3, %v1052_v2  ;;  %vm1092_vm7 = vcmp.eq.s32.totalorder %v3032_v17, %v1052_v2 }
 0x1a0   : > { %v1123_v39 = vsel %vm1091_vm6, 1, %v4764_v22  ;;  %v1124_v0 = vsel %vm1092_vm7, 1, %v4764_v22  ;;  %2529 = vset.pattern.permute.xlu2 %v4762_v4  ;;  %2528 = vset.pattern.permute.xlu1 %v4762_v4  ;;  %v2400_v4 = vld [vmem:[%s4700_s3 + $0x44] sm:$0xf0]  ;;  %vm646_vm6 = vcmp.eq.s32.totalorder %v3032_v17, %v3779_v31  ;;  %vm981_vm7 = vcmp.eq.s32.totalorder %v3019_v3, %v3482_v1 }
 0x1a1   : > { %v1251_v18 = vadd.s32 %v1123_v39, %v1011_v55  ;;  %v1252_v53 = vadd.s32 %v1124_v0, %v1012_v46  ;;  %v3889_v10 = vpop.permute.xlu2 %1054  ;;  %739 = vperm.xlu2 %2529, %v3892_v29   ;;  %736 = vperm.xlu1 %2528, %v3823_v36   ;;  %v2340_v14 = vor.u32 %v2400_v4, %v2339_v28  ;;  %v2395_v46 = vld [vmem:[%s4700_s3 + $0x24] sm:$0xf]  ;;  %v569_v0 = vsel %vm537_vm12, 1, %v4764_v22 }
 0x1a2   : > { %1820 = vmatpush.bf16.msra.mxu3 %v2352_v57  ;;  %v570_v57 = vsel %vm538_vm15, 1, %v4764_v22  ;;  %vm1093_vm8 = vcmp.eq.s32.totalorder %v3019_v3, %v3889_v10  ;;  %vm1094_vm12 = vcmp.eq.s32.totalorder %v3032_v17, %v3889_v10 }
 0x1a3   : > { %v1315_v6 = vadd.s32 %v1251_v18, %v1219_v54  ;;  %v1316_v45 = vadd.s32 %v1252_v53, %v1220_v41  ;;  %1772 = vmatpush.bf16.msra.mxu2 %v2340_v14  ;;  %v457_v54 = vsel %vm425_vm10, 1, %v4764_v22  ;;  %v2324_v53 = vor.u32 %v2396_v52, %v2323_v32  ;;  %v2317_v14 = vld [vmem:[%s4700_s3 + $0x18] sm:$0xf0] }
 0x1a4   : > { %v1161_v39 = vadd.s32 %v457_v54, %v345_v13  ;;  %v2307_v13 = vld [vmem:[%s4700_s3] sm:$0xf]  ;;  %v4781_v54 = vld [vmem:[#allocation20_spill] sm:$0xff]  ;;  %v1014_v32 = vsel %vm982_vm11, 1, %v4764_v22  ;;  %v1126_v52 = vsel %vm1094_vm12, 1, %v4764_v22 }
 0x1a5   : > { %v1347_v61 = vadd.s32 %v1315_v6, %v3362_v43  ;;  %v1348_v12 = vadd.s32 %v1316_v45, %v3369_v16  ;;  %v2398_v43 = vld [vmem:[%s4700_s3 + $0x34] sm:$0xf0]  ;;  %v2315_v6 = vld [vmem:[%s4700_s3 + $0x10] sm:$0xf]  ;;  %vm533_vm5 = vcmp.eq.s32.totalorder %v3019_v3, %v4781_v54  ;;  %vm534_vm10 = vcmp.eq.s32.totalorder %v3032_v17, %v4781_v54 }
 0x1a6   : > { %1821 = vmatpush.bf16.msra.mxu3 %v2344_v38  ;;  %v2332_v2 = vor.u32 %v2398_v43, %v2331_v56  ;;  %v2394_v45 = vld [vmem:[%s4700_s3 + $0x14] sm:$0xf0]  ;;  %v2391_v56 = vld [vmem:[%s4700_s3 + $0x4] sm:$0xf]  ;;  %v565_v51 = vsel %vm533_vm5, 1, %v4764_v22 }
 0x1a7   : > { %v3934_v16 = vpop.permute.xlu1 %718  ;;  %v1379_v50 = vcvt.s32.f32 %v1347_v61  ;;  %v1380_v33 = vcvt.s32.f32 %v1348_v12  ;;  %v2316_v20 = vor.u32 %v2394_v45, %v2315_v6  ;;  %v2320_v61 = vor.u32 %v2393_v35, %v2317_v14  ;;  %v4779_v12 = vld [vmem:[#allocation14_spill] sm:$0xff]  ;;  %v4783_v54 = vld [vmem:[#allocation12_spill] sm:$0xff] }
 0x1a8   : > { %1773 = vmatpush.bf16.msra.mxu2 %v2332_v2  ;;  %vm421_vm14 = vcmp.eq.s32.totalorder %v3019_v3, %v4779_v12  ;;  %vm422_vm4 = vcmp.eq.s32.totalorder %v3032_v17, %v4779_v12  ;;  %v677_v2 = vsel %vm645_vm3, 1, %v4764_v22  ;;  %vm430_vm11 = vcmp.eq.s32.totalorder %v3032_v17, %v4783_v54 }
 0x1a9   : > { %v1403_v9 = vpack.c.bf16 %v1379_v50, %v1377_v44  ;;  %v1404_v7 = vpack.c.bf16 %v1380_v33, %v1378_v25  ;;  %2531 = vset.pattern.permute.xlu2 %v4763_v30  ;;  %2530 = vset.pattern.permute.xlu1 %v4763_v30  ;;  %v2325_v30 = vld [vmem:[%s4700_s3 + $0x28] sm:$0xf0]  ;;  %v4780_v50 = vld [vmem:[#allocation5_spill] sm:$0xff]  ;;  %v453_v25 = vsel %vm421_vm14, 1, %v4764_v22  ;;  %v454_v5 = vsel %vm422_vm4, 1, %v4764_v22 }
 0x1aa   : > { %v613_v55 = vpop.permute.xlu2 %612  ;;  %851 = vperm.xlu2 %2531, %v3892_v29   ;;  %848 = vperm.xlu1 %2530, %v3823_v36   ;;  %v2328_v24 = vor.u32 %v2395_v46, %v2325_v30  ;;  %v2309_v44 = vld [vmem:[%s4700_s3 + $0x8] sm:$0xf0]  ;;  %vm309_vm1 = vcmp.eq.s32.totalorder %v3019_v3, %v4780_v50  ;;  %vm310_vm2 = vcmp.eq.s32.totalorder %v3032_v17, %v4780_v50 }
 0x1ab   : > { %vm649_vm13 = vcmp.eq.s32.totalorder %v3019_v3, %v613_v55  ;;  %vm650_vm0 = vcmp.eq.s32.totalorder %v3032_v17, %v613_v55  ;;  %1568 = vmatmul.bf16.gmra.mxu0 %v1403_v9  ;;  %1617 = vmatmul.bf16.gmra.mxu1 %v1404_v7  ;;  %v2312_v33 = vor.u32 %v2391_v56, %v2309_v44  ;;  %v342_v42 = vsel %vm310_vm2, 1, %v4764_v22 }
 0x1ac   : > { %v681_v41 = vsel %vm649_vm13, 1, %v4764_v22  ;;  %v682_v18 = vsel %vm650_vm0, 1, %v4764_v22  ;;  %1822 = vmatpush.bf16.msra.mxu3 %v2336_v34  ;;  %1774 = vmatpush.bf16.msra.mxu2 %v2324_v53  ;;  %v678_v9 = vsel %vm646_vm6, 1, %v4764_v22  ;;  %vm757_vm13 = vcmp.eq.s32.totalorder %v3019_v3, %v3934_v16 }
 0x1ad   : > { %v1193_v28 = vadd.s32 %v681_v41, %v569_v0  ;;  %v1194_v4 = vadd.s32 %v682_v18, %v570_v57  ;;  %v1013_v7 = vsel %vm981_vm7, 1, %v4764_v22  ;;  %v1125_v34 = vsel %vm1093_vm8, 1, %v4764_v22 }
 0x1ae   : > { %vm758_vm0 = vcmp.eq.s32.totalorder %v3032_v17, %v3934_v16  ;;  %v566_v55 = vsel %vm534_vm10, 1, %v4764_v22  ;;  %vm759_vm14 = vcmp.eq.s32.totalorder %v3019_v3, %v3785_v58  ;;  %v789_v16 = vsel %vm757_vm13, 1, %v4764_v22 }
 0x1af   : > { %v3988_v19 = vadd.s32 %v1193_v28, %v1161_v39  ;;  %v3990_v23 = vadd.s32 %v1194_v4, %v1162_v27  ;;  %v1189_v39 = vadd.s32 %v677_v2, %v565_v51  ;;  %v1190_v0 = vadd.s32 %v678_v9, %v566_v55  ;;  %v4784_v51 = vld [vmem:[#allocation23_spill] sm:$0xff] }
 0x1b0   : > { %v831_v38 = vpop.permute.xlu1 %830  ;;  %1823 = vmatpush.bf16.msra.mxu3 %v2328_v24  ;;  %1775 = vmatpush.bf16.msra.mxu2 %v2316_v20  ;;  %v790_v30 = vsel %vm758_vm0, 1, %v4764_v22  ;;  %vm871_vm2 = vcmp.eq.s32.totalorder %v3019_v3, %v3826_v40  ;;  %vm872_vm4 = vcmp.eq.s32.totalorder %v3032_v17, %v3826_v40  ;;  %v1158_v18 = vadd.s32 %v454_v5, %v342_v42 }
 0x1b1   : > { %vm869_vm9 = vcmp.eq.s32.totalorder %v3019_v3, %v831_v38  ;;  %vm870_vm15 = vcmp.eq.s32.totalorder %v3032_v17, %v831_v38  ;;  %v791_v27 = vsel %vm759_vm14, 1, %v4764_v22  ;;  %v903_v28 = vsel %vm871_vm2, 1, %v4764_v22 }
 0x1b2   : > { %2534 = vset.pattern.permute.xlu2 %v4755_v21  ;;  %2533 = vset.pattern.permute.xlu1 %v4756_v59  ;;  %v2308_v59 = vor.u32 %v2392_v15, %v2307_v13  ;;  %v901_v1 = vsel %vm869_vm9, 1, %v4764_v22  ;;  %v902_v46 = vsel %vm870_vm15, 1, %v4764_v22  ;;  %v904_v4 = vsel %vm872_vm4, 1, %v4764_v22 }
 0x1b3   : > { %v4008_v43 = vpop.permute.xlu2 %727  ;;  %1072 = vperm.xlu2 %2534, %v3823_v36   ;;  %963 = vperm.xlu1 %2533, %v3892_v29   ;;  %v341_v36 = vsel %vm309_vm1, 1, %v4764_v22  ;;  %vm760_vm1 = vcmp.eq.s32.totalorder %v3032_v17, %v3785_v58  ;;  %v1221_v57 = vadd.s32 %v901_v1, %v789_v16  ;;  %v1222_v41 = vadd.s32 %v902_v46, %v790_v30 }
 0x1b4   : > { %1824 = vmatpush.bf16.msra.mxu3 %v2320_v61  ;;  %v1157_v60 = vadd.s32 %v453_v25, %v341_v36  ;;  %1776 = vmatpush.bf16.msra.mxu2 %v2308_v59  ;;  %v792_v58 = vsel %vm760_vm1, 1, %v4764_v22  ;;  %v1286_v45 = vadd.s32 %v1190_v0, %v1158_v18  ;;  %v1223_v12 = vadd.s32 %v903_v28, %v791_v27  ;;  %v4088_v36 = vld [vmem:[%s4699_s2] ss:$0 sm:$0xff] }
 0x1b5   : > { %v1224_v13 = vadd.s32 %v904_v4, %v792_v58  ;;  %vm429_vm10 = vcmp.eq.s32.totalorder %v3019_v3, %v4783_v54  ;;  %vm541_vm12 = vcmp.eq.s32.totalorder %v3019_v3, %v4784_v51  ;;  %vm542_vm15 = vcmp.eq.s32.totalorder %v3032_v17, %v4784_v51 }
 0x1b6   : > { %v1285_v53 = vadd.s32 %v1189_v39, %v1157_v60  ;;  %v4782_v60 = vld [vmem:[#allocation10_spill] sm:$0xff]  ;;  %v573_v16 = vsel %vm541_vm12, 1, %v4764_v22  ;;  %vm651_vm12 = vcmp.eq.s32.totalorder %v3019_v3, %v3627_v11 }
 0x1b7   : > { %vm317_vm8 = vcmp.eq.s32.totalorder %v3019_v3, %v4782_v60  ;;  %vm318_vm9 = vcmp.eq.s32.totalorder %v3032_v17, %v4782_v60  ;;  %v683_v51 = vsel %vm651_vm12, 1, %v4764_v22 }
 0x1b8   : > { %1825 = vmatpush.bf16.msra.mxu3 %v2312_v33 }
 0x1b9   : > { %v946_v31 = vpop.permute.xlu1 %945 }
 0x1ba   : > { %vm983_vm5 = vcmp.eq.s32.totalorder %v3019_v3, %v946_v31  ;;  %vm984_vm3 = vcmp.eq.s32.totalorder %v3032_v17, %v946_v31 }
 0x1bb   : > { %2535 = vset.pattern.permute.xlu1 %v4755_v21  ;;  %v1253_v21 = vadd.s32 %v1125_v34, %v1013_v7  ;;  %v1015_v35 = vsel %vm983_vm5, 1, %v4764_v22  ;;  %v1016_v14 = vsel %vm984_vm3, 1, %v4764_v22  ;;  %vm985_vm5 = vcmp.eq.s32.totalorder %v3019_v3, %v3515_v26 }
 0x1bc   : > { %v4054_v10 = vpop.permute.xlu2 %839  ;;  %1075 = vperm.xlu1 %2535, %v3892_v29   ;;  %v1254_v29 = vadd.s32 %v1126_v52, %v1014_v32  ;;  %v461_v32 = vsel %vm429_vm10, 1, %v4764_v22  ;;  %v462_v52 = vsel %vm430_vm11, 1, %v4764_v22  ;;  %vm986_vm3 = vcmp.eq.s32.totalorder %v3032_v17, %v3515_v26 }
 0x1bd   : > { %v1317_v24 = vadd.s32 %v1253_v21, %v1221_v57  ;;  %v574_v21 = vsel %vm542_vm15, 1, %v4764_v22  ;;  %vm652_vm15 = vcmp.eq.s32.totalorder %v3032_v17, %v3627_v11 }
 0x1be   : > { %v1318_v40 = vadd.s32 %v1254_v29, %v1222_v41 }
 0x1bf   : > { %v1349_v25 = vadd.s32 %v1317_v24, %v1285_v53 }
 0x1c0   : > { %v1350_v42 = vadd.s32 %v1318_v40, %v1286_v45 }
 0x1c1   : > { %v1381_v2 = vcvt.s32.f32 %v1349_v25  ;;  %v1017_v25 = vsel %vm985_vm5, 1, %v4764_v22  ;;  %vm876_vm5 = vcmp.eq.s32.totalorder %v3032_v17, %v4054_v10 }
 0x1c2   : > { %v1058_v6 = vpop.permute.xlu1 %1057  ;;  %v1382_v1 = vcvt.s32.f32 %v1350_v42 }
 0x1c3   : > { %vm1095_vm6 = vcmp.eq.s32.totalorder %v3019_v3, %v1058_v6  ;;  %vm1096_vm7 = vcmp.eq.s32.totalorder %v3032_v17, %v1058_v6 }
 0x1c4   : > { %v1127_v38 = vsel %vm1095_vm6, 1, %v4764_v22  ;;  %v1128_v20 = vsel %vm1096_vm7, 1, %v4764_v22 }
 0x1c5   : > { %v4083_v61 = vpop.permute.xlu2 %1060  ;;  %v1255_v15 = vadd.s32 %v1127_v38, %v1015_v35  ;;  %v1256_v56 = vadd.s32 %v1128_v20, %v1016_v14  ;;  %v1554_v44 = vpop.f32.mrf.mxu0 }
 0x1c6   : > { %v1603_v50 = vpop.f32.mrf.mxu1  ;;  %v1555_v9 = vadd.f32 %v4088_v36, %v1554_v44  ;;  %vm1097_vm6 = vcmp.eq.s32.totalorder %v3019_v3, %v4083_v61  ;;  %vm1098_vm7 = vcmp.eq.s32.totalorder %v3032_v17, %v4083_v61  ;;  %v1018_v61 = vsel %vm986_vm3, 1, %v4764_v22 }
 0x1c7   : > { %v1319_v59 = vadd.s32 %v1255_v15, %v1223_v12  ;;  %v1320_v33 = vadd.s32 %v1256_v56, %v1224_v13  ;;  %v4785_v12 = vld [vmem:[#allocation6_spill] sm:$0xff]  ;;  %v4786_v13 = vld [vmem:[#allocation16_spill] sm:$0xff] }
 0x1c8   : > { %v1604_v57 = vadd.f32 %v1603_v50, %v1555_v9  ;;  %vm315_vm14 = vcmp.eq.s32.totalorder %v3019_v3, %v4785_v12  ;;  %vm427_vm1 = vcmp.eq.s32.totalorder %v3019_v3, %v4786_v13  ;;  %vm428_vm2 = vcmp.eq.s32.totalorder %v3032_v17, %v4786_v13  ;;  %v4787_v50 = vld [vmem:[#allocation21_spill] sm:$0xff] }
 0x1c9   : > { %v1351_v5 = vadd.s32 %v1319_v59, %v3393_v8  ;;  %v1352_v31 = vadd.s32 %v1320_v33, %v3395_v49  ;;  %v349_v8 = vsel %vm317_vm8, 1, %v4764_v22  ;;  %v350_v49 = vsel %vm318_vm9, 1, %v4764_v22 }
 0x1ca   : > { %v1165_v53 = vadd.s32 %v461_v32, %v349_v8  ;;  %v1166_v27 = vadd.s32 %v462_v52, %v350_v49  ;;  %v1643_v40 = vmax.f32 %v1604_v57, 0.0  ;;  %vm316_vm4 = vcmp.eq.s32.totalorder %v3032_v17, %v4785_v12 }
 0x1cb   : > { %v4105_v7 = vpop.permute.xlu1 %724  ;;  %v1383_v34 = vcvt.s32.f32 %v1351_v5  ;;  %v1384_v55 = vcvt.s32.f32 %v1352_v31  ;;  %v347_v15 = vsel %vm315_vm14, 1, %v4764_v22  ;;  %v459_v56 = vsel %vm427_vm1, 1, %v4764_v22 }
 0x1cc   : > { %v460_v44 = vsel %vm428_vm2, 1, %v4764_v22  ;;  %vm539_vm10 = vcmp.eq.s32.totalorder %v3019_v3, %v4787_v50  ;;  %vm540_vm11 = vcmp.eq.s32.totalorder %v3032_v17, %v4787_v50  ;;  %v1129_v59 = vsel %vm1097_vm6, 1, %v4764_v22 }
 0x1cd   : > { %v1405_v39 = vpack.c.bf16 %v1383_v34, %v1381_v2  ;;  %v1406_v0 = vpack.c.bf16 %v1384_v55, %v1382_v1  ;;  %v1556_v30 = vpop.f32.mrf.mxu0  ;;  %v1130_v33 = vsel %vm1098_vm7, 1, %v4764_v22  ;;  %v571_v5 = vsel %vm539_vm10, 1, %v4764_v22 }
 0x1ce   : > { %v619_v46 = vpop.permute.xlu2 %618  ;;  %v1557_v29 = vadd.f32 %v4088_v36, %v1556_v30  ;;  %v1605_v58 = vpop.f32.mrf.mxu1  ;;  %v572_v31 = vsel %vm540_vm11, 1, %v4764_v22  ;;  %v684_v2 = vsel %vm652_vm15, 1, %v4764_v22  ;;  %vm763_vm14 = vcmp.eq.s32.totalorder %v3019_v3, %v4008_v43 }
 0x1cf   : > { %vm653_vm13 = vcmp.eq.s32.totalorder %v3019_v3, %v619_v46  ;;  %vm654_vm0 = vcmp.eq.s32.totalorder %v3032_v17, %v619_v46  ;;  %1573 = vmatmul.bf16.gmra.mxu0 %v1405_v39  ;;  %1622 = vmatmul.bf16.gmra.mxu1 %v1406_v0  ;;  %vm764_vm1 = vcmp.eq.s32.totalorder %v3032_v17, %v4008_v43  ;;  %v348_v32 = vsel %vm316_vm4, 1, %v4764_v22 }
 0x1d0   : > { %v685_v41 = vsel %vm653_vm13, 1, %v4764_v22  ;;  %v686_v18 = vsel %vm654_vm0, 1, %v4764_v22  ;;  %v1606_v24 = vadd.f32 %v1605_v58, %v1557_v29  ;;  %vm761_vm13 = vcmp.eq.s32.totalorder %v3019_v3, %v4105_v7 }
 0x1d1   : > { %v1197_v28 = vadd.s32 %v685_v41, %v573_v16  ;;  %v1198_v4 = vadd.s32 %v686_v18, %v574_v21  ;;  %vm762_vm0 = vcmp.eq.s32.totalorder %v3032_v17, %v4105_v7  ;;  %v793_v7 = vsel %vm761_vm13, 1, %v4764_v22 }
 0x1d2   : > { %v1644_v35 = vmax.f32 %v1606_v24, 0.0  ;;  %v794_v34 = vsel %vm762_vm0, 1, %v4764_v22  ;;  %v1257_v1 = vadd.s32 %v1129_v59, %v1017_v25  ;;  %v1258_v55 = vadd.s32 %v1130_v33, %v1018_v61 }
 0x1d3   : > { %v4118_v6 = vadd.s32 %v1197_v28, %v1165_v53  ;;  %v4120_v45 = vadd.s32 %v1198_v4, %v1166_v27  ;;  %v1163_v52 = vadd.s32 %v459_v56, %v347_v15  ;;  %vm875_vm2 = vcmp.eq.s32.totalorder %v3019_v3, %v4054_v10 }
 0x1d4   : > { %v837_v14 = vpop.permute.xlu1 %836  ;;  %v1659_v38 = vpack.c.bf16 %v1644_v35, %v1643_v40  ;;  %v1164_v46 = vadd.s32 %v460_v44, %v348_v32  ;;  %v1195_v0 = vadd.s32 %v683_v51, %v571_v5  ;;  %v1196_v16 = vadd.s32 %v684_v2, %v572_v31  ;;  %v4789_v5 = vld [vmem:[#allocation17_spill] sm:$0xff] }
 0x1d5   : > { %vm873_vm8 = vcmp.eq.s32.totalorder %v3019_v3, %v837_v14  ;;  %vm874_vm9 = vcmp.eq.s32.totalorder %v3032_v17, %v837_v14  ;;  %v795_v21 = vsel %vm763_vm14, 1, %v4764_v22  ;;  %v796_v30 = vsel %vm764_vm1, 1, %v4764_v22 }
 0x1d6   : > { %1777 = vmatmul.bf16.vlgmr.msra.gmra.mxu2 %v1659_v38  ;;  %1826 = vmatmul.bf16.vlgmr.msra.gmra.mxu3 %v1659_v38  ;;  %v905_v42 = vsel %vm873_vm8, 1, %v4764_v22  ;;  %v906_v60 = vsel %vm874_vm9, 1, %v4764_v22  ;;  %v907_v10 = vsel %vm875_vm2, 1, %v4764_v22  ;;  %v908_v57 = vsel %vm876_vm5, 1, %v4764_v22 }
 0x1d7   : > { %v4122_v20 = vpop.permute.xlu2 %733  ;;  %v1225_v8 = vadd.s32 %v905_v42, %v793_v7  ;;  %v1226_v49 = vadd.s32 %v906_v60, %v794_v34  ;;  %v1227_v35 = vadd.s32 %v907_v10, %v795_v21  ;;  %v1228_v14 = vadd.s32 %v908_v57, %v796_v30  ;;  %v4788_v42 = vld [vmem:[#allocation7_spill] sm:$0xff]  ;;  %v4790_v7 = vld [vmem:[#allocation22_spill] sm:$0xff] }
 0x1d8   : > { %v1291_v15 = vadd.s32 %v1195_v0, %v1163_v52  ;;  %v1292_v56 = vadd.s32 %v1196_v16, %v1164_v46  ;;  %vm321_vm8 = vcmp.eq.s32.totalorder %v3019_v3, %v4788_v42  ;;  %vm322_vm9 = vcmp.eq.s32.totalorder %v3032_v17, %v4788_v42 }
 0x1d9   : > { %v1321_v29 = vadd.s32 %v1257_v1, %v1225_v8  ;;  %v1322_v41 = vadd.s32 %v1258_v55, %v1226_v49  ;;  %vm433_vm10 = vcmp.eq.s32.totalorder %v3019_v3, %v4789_v5  ;;  %vm434_vm11 = vcmp.eq.s32.totalorder %v3032_v17, %v4789_v5 }
 0x1da   : > { %vm545_vm12 = vcmp.eq.s32.totalorder %v3019_v3, %v4790_v7  ;;  %vm546_vm15 = vcmp.eq.s32.totalorder %v3032_v17, %v4790_v7  ;;  %v465_v34 = vsel %vm433_vm10, 1, %v4764_v22  ;;  %v466_v1 = vsel %vm434_vm11, 1, %v4764_v22 }
 0x1db   : > { %v1353_v25 = vadd.s32 %v1321_v29, %v3988_v19  ;;  %v1354_v61 = vadd.s32 %v1322_v41, %v3990_v23  ;;  %v353_v32 = vsel %vm321_vm8, 1, %v4764_v22  ;;  %v354_v52 = vsel %vm322_vm9, 1, %v4764_v22 }
 0x1dc   : > { %v577_v46 = vsel %vm545_vm12, 1, %v4764_v22  ;;  %v1169_v21 = vadd.s32 %v465_v34, %v353_v32  ;;  %v1170_v30 = vadd.s32 %v466_v1, %v354_v52  ;;  %vm989_vm5 = vcmp.eq.s32.totalorder %v3019_v3, %v3553_v47 }
 0x1dd   : > { %v952_v26 = vpop.permute.xlu1 %951  ;;  %v1385_v51 = vcvt.s32.f32 %v1353_v25  ;;  %v1386_v2 = vcvt.s32.f32 %v1354_v61  ;;  %vm767_vm8 = vcmp.eq.s32.totalorder %v3019_v3, %v4122_v20  ;;  %vm768_vm9 = vcmp.eq.s32.totalorder %v3032_v17, %v4122_v20 }
 0x1de   : > { %vm987_vm3 = vcmp.eq.s32.totalorder %v3019_v3, %v952_v26  ;;  %vm988_vm6 = vcmp.eq.s32.totalorder %v3032_v17, %v952_v26  ;;  %v799_v20 = vsel %vm767_vm8, 1, %v4764_v22 }
 0x1df   : > { %v1019_v53 = vsel %vm987_vm3, 1, %v4764_v22  ;;  %v1020_v27 = vsel %vm988_vm6, 1, %v4764_v22 }
 0x1e0   : > { %v1559_v11 = vpop.f32.mrf.mxu0  ;;  %v4163_v54 = vpop.permute.xlu2 %845 }
 0x1e1   : > { %v1608_v9 = vpop.f32.mrf.mxu1  ;;  %v1560_v39 = vadd.f32 %v4088_v36, %v1559_v11  ;;  %vm879_vm10 = vcmp.eq.s32.totalorder %v3019_v3, %v4163_v54  ;;  %vm880_vm11 = vcmp.eq.s32.totalorder %v3032_v17, %v4163_v54 }
 0x1e3   : > { %v1609_v28 = vadd.f32 %v1608_v9, %v1560_v39  ;;  %v578_v39 = vsel %vm546_vm15, 1, %v4764_v22 }
 0x1e5   : > { %v1645_v59 = vmax.f32 %v1609_v28, 0.0 }
 0x1e6   : > { %v1064_v18 = vpop.permute.xlu1 %1063 }
 0x1e7   : > { %vm1099_vm4 = vcmp.eq.s32.totalorder %v3019_v3, %v1064_v18  ;;  %vm1100_vm7 = vcmp.eq.s32.totalorder %v3032_v17, %v1064_v18 }
 0x1e8   : > { %v1561_v58 = vpop.f32.mrf.mxu0  ;;  %v1131_v43 = vsel %vm1099_vm4, 1, %v4764_v22  ;;  %v1132_v4 = vsel %vm1100_vm7, 1, %v4764_v22  ;;  %vm990_vm7 = vcmp.eq.s32.totalorder %v3032_v17, %v3553_v47 }
 0x1e9   : > { %v1562_v24 = vadd.f32 %v4088_v36, %v1561_v58  ;;  %v4203_v40 = vpop.permute.xlu2 %1066  ;;  %v1259_v38 = vadd.s32 %v1131_v43, %v1019_v53  ;;  %v1260_v12 = vadd.s32 %v1132_v4, %v1020_v27  ;;  %v1610_v13 = vpop.f32.mrf.mxu1  ;;  %v1022_v47 = vsel %vm990_vm7, 1, %v4764_v22 }
 0x1ea   : > { %vm1101_vm2 = vcmp.eq.s32.totalorder %v3019_v3, %v4203_v40  ;;  %vm1102_vm3 = vcmp.eq.s32.totalorder %v3032_v17, %v4203_v40 }
 0x1eb   : > { %v1611_v44 = vadd.f32 %v1610_v13, %v1562_v24  ;;  %v1323_v50 = vadd.s32 %v1259_v38, %v1227_v35  ;;  %v1324_v26 = vadd.s32 %v1260_v12, %v1228_v14  ;;  %v1133_v43 = vsel %vm1101_vm2, 1, %v4764_v22 }
 0x1ec   : > { %v1021_v24 = vsel %vm989_vm5, 1, %v4764_v22  ;;  %v1134_v35 = vsel %vm1102_vm3, 1, %v4764_v22 }
 0x1ed   : > { %v1646_v33 = vmax.f32 %v1611_v44, 0.0  ;;  %v1355_v60 = vadd.s32 %v1323_v50, %v1291_v15  ;;  %v1356_v11 = vadd.s32 %v1324_v26, %v1292_v56  ;;  %v1261_v13 = vadd.s32 %v1133_v43, %v1021_v24 }
 0x1ee   : > { %v1262_v15 = vadd.s32 %v1134_v35, %v1022_v47  ;;  %v800_v44 = vsel %vm768_vm9, 1, %v4764_v22  ;;  %v911_v50 = vsel %vm879_vm10, 1, %v4764_v22  ;;  %v912_v26 = vsel %vm880_vm11, 1, %v4764_v22 }
 0x1ef   : > { %v1660_v31 = vpack.c.bf16 %v1646_v33, %v1645_v59  ;;  %v731_v19 = vpop.permute.xlu1 %730  ;;  %v1387_v23 = vcvt.s32.f32 %v1355_v60  ;;  %v1388_v9 = vcvt.s32.f32 %v1356_v11 }
 0x1f0   : > { %vm765_vm6 = vcmp.eq.s32.totalorder %v3019_v3, %v731_v19  ;;  %vm766_vm4 = vcmp.eq.s32.totalorder %v3032_v17, %v731_v19  ;;  %v1231_v19 = vadd.s32 %v911_v50, %v799_v20 }
 0x1f1   : > { %1782 = vmatmul.bf16.gmra.mxu2 %v1660_v31  ;;  %1831 = vmatmul.bf16.gmra.mxu3 %v1660_v31  ;;  %v1407_v8 = vpack.c.bf16 %v1387_v23, %v1385_v51  ;;  %v1408_v49 = vpack.c.bf16 %v1388_v9, %v1386_v2  ;;  %v797_v40 = vsel %vm765_vm6, 1, %v4764_v22  ;;  %v798_v14 = vsel %vm766_vm4, 1, %v4764_v22 }
 0x1f2   : > { %v625_v55 = vpop.permute.xlu2 %624  ;;  %v1232_v51 = vadd.s32 %v912_v26, %v800_v44 }
 0x1f3   : > { %vm657_vm13 = vcmp.eq.s32.totalorder %v3019_v3, %v625_v55  ;;  %vm658_vm0 = vcmp.eq.s32.totalorder %v3032_v17, %v625_v55  ;;  %1578 = vmatmul.bf16.gmra.mxu0 %v1407_v8  ;;  %1627 = vmatmul.bf16.gmra.mxu1 %v1408_v49 }
 0x1f4   : > { %v689_v0 = vsel %vm657_vm13, 1, %v4764_v22  ;;  %v690_v16 = vsel %vm658_vm0, 1, %v4764_v22 }
 0x1f5   : > { %v1201_v10 = vadd.s32 %v689_v0, %v577_v46  ;;  %v1202_v57 = vadd.s32 %v690_v16, %v578_v39 }
 0x1f7   : > { %v4235_v29 = vadd.s32 %v1201_v10, %v1169_v21  ;;  %v4237_v41 = vadd.s32 %v1202_v57, %v1170_v30 }
 0x1f8   : > { %v843_v18 = vpop.permute.xlu1 %842 }
 0x1f9   : > { %vm877_vm14 = vcmp.eq.s32.totalorder %v3019_v3, %v843_v18  ;;  %vm878_vm1 = vcmp.eq.s32.totalorder %v3032_v17, %v843_v18 }
 0x1fa   : > { %v909_v27 = vsel %vm877_vm14, 1, %v4764_v22  ;;  %v910_v58 = vsel %vm878_vm1, 1, %v4764_v22 }
 0x1fb   : > { %v1229_v38 = vadd.s32 %v909_v27, %v797_v40  ;;  %v1230_v12 = vadd.s32 %v910_v58, %v798_v14  ;;  %v740_v9 = vpop.permute.xlu2 %739 }
 0x1fc   : > { %vm771_vm8 = vcmp.eq.s32.totalorder %v3019_v3, %v740_v9  ;;  %vm772_vm9 = vcmp.eq.s32.totalorder %v3032_v17, %v740_v9 }
 0x1fd   : > { %v1325_v25 = vadd.s32 %v1261_v13, %v1229_v38  ;;  %v1326_v61 = vadd.s32 %v1262_v15, %v1230_v12  ;;  %v803_v44 = vsel %vm771_vm8, 1, %v4764_v22  ;;  %v804_v50 = vsel %vm772_vm9, 1, %v4764_v22 }
 0x1ff   : > { %v1357_v8 = vadd.s32 %v1325_v25, %v4118_v6  ;;  %v1358_v49 = vadd.s32 %v1326_v61, %v4120_v45  ;;  %v961_v45 = vpop.permute.xlu0 %960 }
 0x200   : > { %vm993_vm14 = vcmp.eq.s32.totalorder %v3019_v3, %v961_v45  ;;  %vm994_vm1 = vcmp.eq.s32.totalorder %v3032_v17, %v961_v45 }
 0x201   : > { %v958_v53 = vpop.permute.xlu1 %957  ;;  %v1389_v21 = vcvt.s32.f32 %v1357_v8  ;;  %v1390_v10 = vcvt.s32.f32 %v1358_v49 }
 0x202   : > { %vm991_vm12 = vcmp.eq.s32.totalorder %v3019_v3, %v958_v53  ;;  %vm992_vm15 = vcmp.eq.s32.totalorder %v3032_v17, %v958_v53 }
 0x203   : > { %v1023_v54 = vsel %vm991_vm12, 1, %v4764_v22  ;;  %v1024_v33 = vsel %vm992_vm15, 1, %v4764_v22 }
 0x204   : > { %v1564_v28 = vpop.f32.mrf.mxu0  ;;  %v1613_v4 = vpop.f32.mrf.mxu1 }
 0x205   : > { %v1565_v56 = vadd.f32 %v4088_v36, %v1564_v28  ;;  %v852_v27 = vpop.permute.xlu2 %851  ;;  %v1026_v28 = vsel %vm994_vm1, 1, %v4764_v22 }
 0x206   : > { %vm883_vm10 = vcmp.eq.s32.totalorder %v3019_v3, %v852_v27  ;;  %vm884_vm11 = vcmp.eq.s32.totalorder %v3032_v17, %v852_v27 }
 0x207   : > { %v1614_v60 = vadd.f32 %v1613_v4, %v1565_v56  ;;  %v915_v26 = vsel %vm883_vm10, 1, %v4764_v22  ;;  %v916_v25 = vsel %vm884_vm11, 1, %v4764_v22 }
 0x209   : > { %v1647_v32 = vmax.f32 %v1614_v60, 0.0 }
 0x20a   : > { %v1070_v59 = vpop.permute.xlu1 %1069 }
 0x20b   : > { %vm1103_vm13 = vcmp.eq.s32.totalorder %v3019_v3, %v1070_v59  ;;  %vm1104_vm0 = vcmp.eq.s32.totalorder %v3032_v17, %v1070_v59 }
 0x20c   : > { %v1566_v42 = vpop.f32.mrf.mxu0  ;;  %v1135_v11 = vsel %vm1103_vm13, 1, %v4764_v22  ;;  %v1136_v5 = vsel %vm1104_vm0, 1, %v4764_v22  ;;  %v1615_v7 = vpop.f32.mrf.mxu1 }
 0x20d   : > { %v1567_v31 = vadd.f32 %v4088_v36, %v1566_v42  ;;  %v1263_v23 = vadd.s32 %v1135_v11, %v1023_v54  ;;  %v1264_v2 = vadd.s32 %v1136_v5, %v1024_v33  ;;  %v1073_v58 = vpop.permute.xlu2 %1072 }
 0x20e   : > { %vm1105_vm2 = vcmp.eq.s32.totalorder %v3019_v3, %v1073_v58  ;;  %vm1106_vm5 = vcmp.eq.s32.totalorder %v3032_v17, %v1073_v58 }
 0x20f   : > { %v1616_v34 = vadd.f32 %v1615_v7, %v1567_v31  ;;  %v1327_v1 = vadd.s32 %v1263_v23, %v1231_v19  ;;  %v1328_v55 = vadd.s32 %v1264_v2, %v1232_v51  ;;  %v1137_v43 = vsel %vm1105_vm2, 1, %v4764_v22 }
 0x210   : > { %v1138_v4 = vsel %vm1106_vm5, 1, %v4764_v22  ;;  %v1235_v51 = vadd.s32 %v915_v26, %v803_v44  ;;  %v1236_v23 = vadd.s32 %v916_v25, %v804_v50 }
 0x211   : > { %v1648_v52 = vmax.f32 %v1616_v34, 0.0  ;;  %v1359_v46 = vadd.s32 %v1327_v1, %v3726_v37  ;;  %v1360_v39 = vadd.s32 %v1328_v55, %v3728_v63  ;;  %v1025_v63 = vsel %vm993_vm14, 1, %v4764_v22 }
 0x212   : > { %v1265_v15 = vadd.s32 %v1137_v43, %v1025_v63  ;;  %v1266_v56 = vadd.s32 %v1138_v4, %v1026_v28 }
 0x213   : > { %v1661_v0 = vpack.c.bf16 %v1648_v52, %v1647_v32  ;;  %v737_v16 = vpop.permute.xlu1 %736  ;;  %v1391_v30 = vcvt.s32.f32 %v1359_v46  ;;  %v1392_v57 = vcvt.s32.f32 %v1360_v39 }
 0x214   : > { %vm769_vm4 = vcmp.eq.s32.totalorder %v3019_v3, %v737_v16  ;;  %vm770_vm7 = vcmp.eq.s32.totalorder %v3032_v17, %v737_v16 }
 0x215   : > { %1787 = vmatmul.bf16.gmra.mxu2 %v1661_v0  ;;  %1836 = vmatmul.bf16.gmra.mxu3 %v1661_v0  ;;  %v1409_v18 = vpack.c.bf16 %v1391_v30, %v1389_v21  ;;  %v1410_v53 = vpack.c.bf16 %v1392_v57, %v1390_v10  ;;  %v801_v38 = vsel %vm769_vm4, 1, %v4764_v22  ;;  %v802_v12 = vsel %vm770_vm7, 1, %v4764_v22 }
 0x217   : > { %1583 = vmatmul.bf16.gmra.mxu0 %v1409_v18  ;;  %1632 = vmatmul.bf16.gmra.mxu1 %v1410_v53 }
 0x21c   : > { %v849_v6 = vpop.permute.xlu1 %848 }
 0x21d   : > { %vm881_vm3 = vcmp.eq.s32.totalorder %v3019_v3, %v849_v6  ;;  %vm882_vm6 = vcmp.eq.s32.totalorder %v3032_v17, %v849_v6 }
 0x21e   : > { %v913_v24 = vsel %vm881_vm3, 1, %v4764_v22  ;;  %v914_v35 = vsel %vm882_vm6, 1, %v4764_v22 }
 0x21f   : > { %v1233_v47 = vadd.s32 %v913_v24, %v801_v38  ;;  %v1234_v13 = vadd.s32 %v914_v35, %v802_v12 }
 0x221   : > { %v1329_v61 = vadd.s32 %v1265_v15, %v1233_v47  ;;  %v1330_v59 = vadd.s32 %v1266_v56, %v1234_v13 }
 0x225   : > { %v964_v37 = vpop.permute.xlu1 %963 }
 0x226   : > { %vm995_vm12 = vcmp.eq.s32.totalorder %v3019_v3, %v964_v37  ;;  %vm996_vm15 = vcmp.eq.s32.totalorder %v3032_v17, %v964_v37 }
 0x227   : > { %v1027_v33 = vsel %vm995_vm12, 1, %v4764_v22  ;;  %v1028_v42 = vsel %vm996_vm15, 1, %v4764_v22 }
 0x228   : > { %v1569_v40 = vpop.f32.mrf.mxu0  ;;  %v1618_v14 = vpop.f32.mrf.mxu1 }
 0x229   : > { %v1570_v20 = vadd.f32 %v4088_v36, %v1569_v40 }
 0x22b   : > { %v1619_v11 = vadd.f32 %v1618_v14, %v1570_v20 }
 0x22d   : > { %v1649_v8 = vmax.f32 %v1619_v11, 0.0 }
 0x22e   : > { %v1076_v54 = vpop.permute.xlu1 %1075 }
 0x22f   : > { %vm1107_vm13 = vcmp.eq.s32.totalorder %v3019_v3, %v1076_v54  ;;  %vm1108_vm0 = vcmp.eq.s32.totalorder %v3032_v17, %v1076_v54  ;;  %v1361_v3 = vadd.s32 %v1329_v61, %v4235_v29  ;;  %v1362_v17 = vadd.s32 %v1330_v59, %v4237_v41 }
 0x230   : > { %v1571_v60 = vpop.f32.mrf.mxu0  ;;  %v1139_v5 = vsel %vm1107_vm13, 1, %v4764_v22  ;;  %v1140_v31 = vsel %vm1108_vm0, 1, %v4764_v22  ;;  %v1620_v7 = vpop.f32.mrf.mxu1 }
 0x231   : > { %v1572_v19 = vadd.f32 %v4088_v36, %v1571_v60  ;;  %v1267_v2 = vadd.s32 %v1139_v5, %v1027_v33  ;;  %v1268_v9 = vadd.s32 %v1140_v31, %v1028_v42  ;;  %v1393_v46 = vcvt.s32.f32 %v1361_v3 }
 0x232   : > { %v1394_v0 = vcvt.s32.f32 %v1362_v17 }
 0x233   : > { %v1621_v34 = vadd.f32 %v1620_v7, %v1572_v19  ;;  %v1331_v1 = vadd.s32 %v1267_v2, %v1235_v51  ;;  %v1332_v55 = vadd.s32 %v1268_v9, %v1236_v23 }
 0x235   : > { %v1650_v49 = vmax.f32 %v1621_v34, 0.0  ;;  %v1363_v32 = vadd.s32 %v1331_v1, %v3772_v48  ;;  %v1364_v22 = vadd.s32 %v1332_v55, %v3774_v62  ;;  %v1683_v48 = vld [vmem:[%s4701_s4] sm:$0x3] }
 0x236   : > { %v4328_v6 = vperm.slane %v1683_v48, 0  ;;  %v4330_v45 = vperm.slane %v1683_v48, 1 }
 0x237   : > { %v1662_v52 = vpack.c.bf16 %v1650_v49, %v1649_v8  ;;  %v1395_v39 = vcvt.s32.f32 %v1363_v32  ;;  %v1396_v16 = vcvt.s32.f32 %v1364_v22 }
 0x239   : > { %1792 = vmatmul.bf16.gmra.mxu2 %v1662_v52  ;;  %1841 = vmatmul.bf16.gmra.mxu3 %v1662_v52  ;;  %v1411_v21 = vpack.c.bf16 %v1395_v39, %v1393_v46  ;;  %v1412_v30 = vpack.c.bf16 %v1396_v16, %v1394_v0 }
 0x23b   : > { %1588 = vmatmul.bf16.gmra.mxu0 %v1411_v21  ;;  %1637 = vmatmul.bf16.gmra.mxu1 %v1412_v30 }
 0x24c   : > { %v1574_v29 = vpop.f32.mrf.mxu0  ;;  %v1623_v10 = vpop.f32.mrf.mxu1 }
 0x24d   : > { %v1575_v41 = vadd.f32 %v4088_v36, %v1574_v29 }
 0x24f   : > { %v1624_v62 = vadd.f32 %v1623_v10, %v1575_v41 }
 0x251   : > { %v1651_v58 = vmax.f32 %v1624_v62, 0.0 }
 0x254   : > { %v1576_v57 = vpop.f32.mrf.mxu0  ;;  %v1625_v53 = vpop.f32.mrf.mxu1 }
 0x255   : > { %v1577_v18 = vadd.f32 %v4088_v36, %v1576_v57 }
 0x257   : > { %v1626_v27 = vadd.f32 %v1625_v53, %v1577_v18 }
 0x259   : > { %v1652_v37 = vmax.f32 %v1626_v27, 0.0  ;;  %v1778_v63 = vpop.f32.mrf.mxu2  ;;  %v1827_v28 = vpop.f32.mrf.mxu3 }
 0x25a   : > { %v4333_v43 = vadd.f32 %v1778_v63, %v4328_v6  ;;  %v4336_v4 = vadd.f32 %v1827_v28, %v4330_v45 }
 0x25b   : > { %v1663_v24 = vpack.c.bf16 %v1652_v37, %v1651_v58 }
 0x25c   : > { %v1867_v35 = vmax.f32 %v4333_v43, %v4336_v4 }
 0x25d   : > { %1797 = vmatmul.bf16.gmra.mxu2 %v1663_v24  ;;  %1846 = vmatmul.bf16.gmra.mxu3 %v1663_v24 }
 0x25e   : > { %1868 = vmax.xlane.f32.xlu2 %v1867_v35 }
 0x261   : > { %v1780_v40 = vpop.f32.mrf.mxu2  ;;  %v1829_v14 = vpop.f32.mrf.mxu3 }
 0x262   : > { %v4341_v38 = vadd.f32 %v1780_v40, %v4328_v6  ;;  %v4344_v12 = vadd.f32 %v1829_v14, %v4330_v45 }
 0x264   : > { %v1870_v47 = vmax.f32 %v4341_v38, %v4344_v12 }
 0x266   : > { %1871 = vmax.xlane.f32.xlu0 %v1870_v47 }
 0x270   : > { %v1579_v13 = vpop.f32.mrf.mxu0  ;;  %v1628_v15 = vpop.f32.mrf.mxu1 }
 0x271   : > { %v1580_v26 = vadd.f32 %v4088_v36, %v1579_v13 }
 0x273   : > { %v1629_v59 = vadd.f32 %v1628_v15, %v1580_v26 }
 0x274   : > { %v1783_v56 = vpop.f32.mrf.mxu2  ;;  %v1832_v20 = vpop.f32.mrf.mxu3 }
 0x275   : > { %v4349_v44 = vadd.f32 %v1783_v56, %v4328_v6  ;;  %v4352_v50 = vadd.f32 %v1832_v20, %v4330_v45  ;;  %v1653_v19 = vmax.f32 %v1629_v59, 0.0 }
 0x277   : > { %v1873_v25 = vmax.f32 %v4349_v44, %v4352_v50 }
 0x278   : > { %v1581_v61 = vpop.f32.mrf.mxu0  ;;  %v1630_v33 = vpop.f32.mrf.mxu1 }
 0x279   : > { %1874 = vmax.xlane.f32.xlu1 %v1873_v25  ;;  %v1582_v54 = vadd.f32 %v4088_v36, %v1581_v61 }
 0x27b   : > { %v1631_v42 = vadd.f32 %v1630_v33, %v1582_v54 }
 0x27c   : > { %v1785_v60 = vpop.f32.mrf.mxu2  ;;  %v1834_v11 = vpop.f32.mrf.mxu3 }
 0x27d   : > { %v4359_v5 = vadd.f32 %v1785_v60, %v4328_v6  ;;  %v4362_v31 = vadd.f32 %v1834_v11, %v4330_v45  ;;  %v1654_v51 = vmax.f32 %v1631_v42, 0.0 }
 0x27f   : > { %v1876_v23 = vmax.f32 %v4359_v5, %v4362_v31  ;;  %v1664_v2 = vpack.c.bf16 %v1654_v51, %v1653_v19 }
 0x281   : > { %1877 = vmax.xlane.f32.xlu2 %v1876_v23  ;;  %1802 = vmatmul.bf16.gmra.mxu2 %v1664_v2 }
 0x282   : > { %1851 = vmatmul.bf16.gmra.mxu3 %v1664_v2 }
 0x294   : > { %v1584_v9 = vpop.f32.mrf.mxu0  ;;  %v1633_v7 = vpop.f32.mrf.mxu1 }
 0x295   : > { %v1585_v17 = vadd.f32 %v4088_v36, %v1584_v9 }
 0x297   : > { %v1634_v32 = vadd.f32 %v1633_v7, %v1585_v17 }
 0x298   : > { %v1788_v34 = vpop.f32.mrf.mxu2  ;;  %v1837_v1 = vpop.f32.mrf.mxu3 }
 0x299   : > { %v4367_v55 = vadd.f32 %v1788_v34, %v4328_v6  ;;  %v4370_v3 = vadd.f32 %v1837_v1, %v4330_v45  ;;  %v1655_v30 = vmax.f32 %v1634_v32, 0.0 }
 0x29b   : > { %v1879_v8 = vmax.f32 %v4367_v55, %v4370_v3 }
 0x29c   : > { %v1586_v49 = vpop.f32.mrf.mxu0  ;;  %v1635_v52 = vpop.f32.mrf.mxu1 }
 0x29d   : > { %1880 = vmax.xlane.f32.xlu2 %v1879_v8  ;;  %v1587_v22 = vadd.f32 %v4088_v36, %v1586_v49 }
 0x29f   : > { %v1636_v46 = vadd.f32 %v1635_v52, %v1587_v22 }
 0x2a0   : > { %v1790_v39 = vpop.f32.mrf.mxu2  ;;  %v1839_v0 = vpop.f32.mrf.mxu3 }
 0x2a1   : > { %v4377_v16 = vadd.f32 %v1790_v39, %v4328_v6  ;;  %v4380_v21 = vadd.f32 %v1839_v0, %v4330_v45  ;;  %v1656_v29 = vmax.f32 %v1636_v46, 0.0 }
 0x2a3   : > { %v1882_v10 = vmax.f32 %v4377_v16, %v4380_v21  ;;  %v1665_v41 = vpack.c.bf16 %v1656_v29, %v1655_v30 }
 0x2a5   : > { %1883 = vmax.xlane.f32.xlu0 %v1882_v10  ;;  %1807 = vmatmul.bf16.gmra.mxu2 %v1665_v41 }
 0x2a6   : > { %1856 = vmatmul.bf16.gmra.mxu3 %v1665_v41 }
 0x2b8   : > { %v1589_v57 = vpop.f32.mrf.mxu0  ;;  %v1638_v48 = vpop.f32.mrf.mxu1 }
 0x2b9   : > { %v1590_v58 = vadd.f32 %v4088_v36, %v1589_v57 }
 0x2bb   : > { %v1639_v28 = vadd.f32 %v1638_v48, %v1590_v58 }
 0x2bc   : > { %v1793_v62 = vpop.f32.mrf.mxu2  ;;  %v1842_v18 = vpop.f32.mrf.mxu3 }
 0x2bd   : > { %v4385_v53 = vadd.f32 %v1793_v62, %v4328_v6  ;;  %v4388_v27 = vadd.f32 %v1842_v18, %v4330_v45  ;;  %v1657_v56 = vmax.f32 %v1639_v28, 0.0 }
 0x2bf   : > { %v1885_v37 = vmax.f32 %v4385_v53, %v4388_v27 }
 0x2c0   : > { %v1591_v63 = vpop.f32.mrf.mxu0  ;;  %v1640_v35 = vpop.f32.mrf.mxu1 }
 0x2c1   : > { %1886 = vmax.xlane.f32.xlu1 %v1885_v37  ;;  %v1592_v24 = vadd.f32 %v4088_v36, %v1591_v63 }
 0x2c3   : > { %v1641_v40 = vadd.f32 %v1640_v35, %v1592_v24 }
 0x2c4   : > { %v1795_v14 = vpop.f32.mrf.mxu2  ;;  %v1844_v47 = vpop.f32.mrf.mxu3 }
 0x2c5   : > { %v4395_v13 = vadd.f32 %v1795_v14, %v4328_v6  ;;  %v4398_v15 = vadd.f32 %v1844_v47, %v4330_v45  ;;  %v1658_v20 = vmax.f32 %v1641_v40, 0.0 }
 0x2c7   : > { %v1888_v26 = vmax.f32 %v4395_v13, %v4398_v15  ;;  %v1666_v25 = vpack.c.bf16 %v1658_v20, %v1657_v56 }
 0x2c9   : > { %1889 = vmax.xlane.f32.xlu2 %v1888_v26  ;;  %1812 = vmatmul.bf16.gmra.mxu2 %v1666_v25 }
 0x2ca   : > { %1861 = vmatmul.bf16.gmra.mxu3 %v1666_v25 }
 0x2d1   : > { %v1869_v22 = vpop.xlane.xlu2 %1868 }
 0x2d2   : > { %v4435_v39 = vsub.f32 %v4333_v43, %v1869_v22  ;;  %v4444_v29 = vsub.f32 %v4336_v4, %v1869_v22 }
 0x2d4   : > { %v1947_v41 = vmul.f32 1.442695, %v4435_v39  ;;  %v1949_v57 = vmul.f32 1.442695, %v4444_v29 }
 0x2d6   : > { %2538 = vpow2.f32 %v1947_v41 }
 0x2d7   : > { %2540 = vpow2.f32 %v1949_v57 }
 0x2dc   : > { %v2539_v40 = vpop.eup %2538 }
 0x2dd   : > { %v2541_v14 = vpop.eup %2540 }
 0x2e0   : > { %v1798_v36 = vpop.f32.mrf.mxu2  ;;  %v1847_v61 = vpop.f32.mrf.mxu3 }
 0x2e1   : > { %v4403_v59 = vadd.f32 %v1798_v36, %v4328_v6  ;;  %v4406_v54 = vadd.f32 %v1847_v61, %v4330_v45  ;;  %v1872_v61 = vpop.xlane.xlu0 %1871 }
 0x2e3   : > { %v1891_v33 = vmax.f32 %v4403_v59, %v4406_v54 }
 0x2e5   : > { %1892 = vmax.xlane.f32.xlu0 %v1891_v33 }
 0x2e8   : > { %v1800_v42 = vpop.f32.mrf.mxu2  ;;  %v1849_v60 = vpop.f32.mrf.mxu3 }
 0x2e9   : > { %v4411_v11 = vadd.f32 %v1800_v42, %v4328_v6  ;;  %v4414_v19 = vadd.f32 %v1849_v60, %v4330_v45  ;;  %v4475_v42 = vsub.f32 %v4341_v38, %v1872_v61 }
 0x2eb   : > { %v1894_v51 = vmax.f32 %v4411_v11, %v4414_v19 }
 0x2ec   : > { %v1875_v48 = vpop.xlane.xlu1 %1874 }
 0x2ed   : > { %1895 = vmax.xlane.f32.xlu1 %v1894_v51  ;;  %v1951_v51 = vmul.f32 1.442695, %v4475_v42 }
 0x2f4   : > { %v1878_v43 = vpop.xlane.xlu2 %1877 }
 0x2f5   : > { %v4451_v58 = vsub.f32 %v4359_v5, %v1878_v43  ;;  %v4460_v63 = vsub.f32 %v4362_v31, %v1878_v43  ;;  %v2011_v31 = vadd.f32 %v2541_v14, %v2539_v40 }
 0x2f7   : > { %v1959_v24 = vmul.f32 1.442695, %v4451_v58  ;;  %v1961_v35 = vmul.f32 1.442695, %v4460_v63 }
 0x2f9   : > { %2542 = vpow2.f32 %v1959_v24 }
 0x2fa   : > { %2544 = vpow2.f32 %v1961_v35 }
 0x2ff   : > { %v2543_v25 = vpop.eup %2542 }
 0x300   : > { %v2545_v36 = vpop.eup %2544 }
 0x301   : > { %v2020_v33 = vadd.f32 %v2545_v36, %v2543_v25 }
 0x304   : > { %v1803_v23 = vpop.f32.mrf.mxu2 }
 0x305   : > { %v1852_v2 = vpop.f32.mrf.mxu3  ;;  %v4419_v9 = vadd.f32 %v1803_v23, %v4328_v6 }
 0x306   : > { %v4422_v7 = vadd.f32 %v1852_v2, %v4330_v45 }
 0x308   : > { %v1897_v34 = vmax.f32 %v4419_v9, %v4422_v7 }
 0x30a   : > { %1898 = vmax.xlane.f32.xlu2 %v1897_v34  ;;  %v4483_v34 = vsub.f32 %v4349_v44, %v1875_v48 }
 0x30c   : > { %v1805_v1 = vpop.f32.mrf.mxu2 }
 0x30d   : > { %v1854_v17 = vpop.f32.mrf.mxu3  ;;  %v4427_v8 = vadd.f32 %v1805_v1, %v4328_v6 }
 0x30e   : > { %v4430_v49 = vadd.f32 %v1854_v17, %v4330_v45  ;;  %v4486_v17 = vsub.f32 %v4352_v50, %v1875_v48  ;;  %v1955_v50 = vmul.f32 1.442695, %v4483_v34 }
 0x310   : > { %v1900_v32 = vmax.f32 %v4427_v8, %v4430_v49  ;;  %v1881_v2 = vpop.xlane.xlu2 %1880 }
 0x311   : > { %v4498_v44 = vsub.f32 %v4370_v3, %v1881_v2 }
 0x312   : > { %1901 = vmax.xlane.f32.xlu0 %v1900_v32 }
 0x313   : > { %v1965_v57 = vmul.f32 1.442695, %v4498_v44 }
 0x328   : > { %v1808_v52 = vpop.f32.mrf.mxu2 }
 0x329   : > { %v1857_v46 = vpop.f32.mrf.mxu3  ;;  %v4438_v0 = vadd.f32 %v1808_v52, %v4328_v6 }
 0x32a   : > { %v4441_v30 = vadd.f32 %v1857_v46, %v4330_v45 }
 0x32c   : > { %v1903_v10 = vmax.f32 %v4438_v0, %v4441_v30 }
 0x32e   : > { %1904 = vmax.xlane.f32.xlu1 %v1903_v10  ;;  %v1957_v10 = vmul.f32 1.442695, %v4486_v17 }
 0x330   : > { %v1810_v62 = vpop.f32.mrf.mxu2 }
 0x331   : > { %v1859_v18 = vpop.f32.mrf.mxu3  ;;  %v4454_v37 = vadd.f32 %v1810_v62, %v4328_v6 }
 0x332   : > { %v4457_v4 = vadd.f32 %v1859_v18, %v4330_v45 }
 0x334   : > { %v1906_v28 = vmax.f32 %v4454_v37, %v4457_v4  ;;  %v1887_v5 = vpop.xlane.xlu1 %1886 }
 0x335   : > { %v4467_v47 = vsub.f32 %v4385_v53, %v1887_v5  ;;  %v4470_v56 = vsub.f32 %v4388_v27, %v1887_v5  ;;  %v4478_v53 = vsub.f32 %v4344_v12, %v1872_v61  ;;  %v4489_v12 = vsub.f32 %v4367_v55, %v1881_v2  ;;  %v1884_v55 = vpop.xlane.xlu0 %1883 }
 0x336   : > { %1907 = vmax.xlane.f32.xlu2 %v1906_v28  ;;  %v4507_v62 = vsub.f32 %v4377_v16, %v1884_v55  ;;  %v4510_v18 = vsub.f32 %v4380_v21, %v1884_v55 }
 0x337   : > { %v1971_v20 = vmul.f32 1.442695, %v4467_v47  ;;  %v1973_v26 = vmul.f32 1.442695, %v4470_v56  ;;  %v1953_v23 = vmul.f32 1.442695, %v4478_v53 }
 0x338   : > { %v1963_v41 = vmul.f32 1.442695, %v4489_v12  ;;  %v1967_v14 = vmul.f32 1.442695, %v4507_v62 }
 0x339   : > { %2546 = vpow2.f32 %v1971_v20  ;;  %v1969_v20 = vmul.f32 1.442695, %v4510_v18 }
 0x33a   : > { %2548 = vpow2.f32 %v1973_v26 }
 0x33b   : > { %2550 = vpow2.f32 %v1951_v51 }
 0x33c   : > { %2552 = vpow2.f32 %v1953_v23  ;;  %v1890_v48 = vpop.xlane.xlu2 %1889 }
 0x33d   : > { %2554 = vpow2.f32 %v1955_v50  ;;  %v4513_v35 = vsub.f32 %v4395_v13, %v1890_v48  ;;  %v4522_v16 = vsub.f32 %v4398_v15, %v1890_v48 }
 0x33e   : > { %2012 = vadd.xlane.f32.xlu2 %v2011_v31  ;;  %2556 = vpow2.f32 %v1957_v10 }
 0x33f   : > { %v2547_v27 = vpop.eup %2546  ;;  %2558 = vpow2.f32 %v1963_v41  ;;  %v1977_v25 = vmul.f32 1.442695, %v4522_v16 }
 0x340   : > { %v2549_v60 = vpop.eup %2548  ;;  %2560 = vpow2.f32 %v1965_v57 }
 0x341   : > { %v2029_v1 = vadd.f32 %v2549_v60, %v2547_v27  ;;  %v2551_v43 = vpop.eup %2550  ;;  %2562 = vpow2.f32 %v1967_v14 }
 0x342   : > { %v2553_v3 = vpop.eup %2552  ;;  %2564 = vpow2.f32 %v1969_v20 }
 0x343   : > { %v2014_v31 = vadd.f32 %v2553_v3, %v2551_v43  ;;  %v2555_v26 = vpop.eup %2554 }
 0x346   : > { %2021 = vadd.xlane.f32.xlu2 %v2020_v33 }
 0x34c   : > { %v1813_v38 = vpop.f32.mrf.mxu2 }
 0x34d   : > { %v1862_v32 = vpop.f32.mrf.mxu3  ;;  %v4492_v22 = vadd.f32 %v1813_v38, %v4328_v6 }
 0x34e   : > { %v4495_v52 = vadd.f32 %v1862_v32, %v4330_v45  ;;  %2030 = vadd.xlane.f32.xlu2 %v2029_v1 }
 0x350   : > { %v1909_v46 = vmax.f32 %v4492_v22, %v4495_v52 }
 0x352   : > { %1910 = vmax.xlane.f32.xlu0 %v1909_v46 }
 0x354   : > { %v1815_v28 = vpop.f32.mrf.mxu2 }
 0x355   : > { %v1864_v24 = vpop.f32.mrf.mxu3  ;;  %v4516_v5 = vadd.f32 %v1815_v28, %v4328_v6  ;;  %v1975_v6 = vmul.f32 1.442695, %v4513_v35 }
 0x356   : > { %v4519_v40 = vadd.f32 %v1864_v24, %v4330_v45  ;;  %v2557_v45 = vpop.eup %2556 }
 0x357   : > { %v2559_v36 = vpop.eup %2558  ;;  %2566 = vpow2.f32 %v1975_v6  ;;  %v2017_v60 = vadd.f32 %v2557_v45, %v2555_v26 }
 0x358   : > { %v1912_v21 = vmax.f32 %v4516_v5, %v4519_v40  ;;  %v1893_v13 = vpop.xlane.xlu0 %1892  ;;  %v2561_v61 = vpop.eup %2560  ;;  %2568 = vpow2.f32 %v1977_v25 }
 0x359   : > { %v4531_v15 = vsub.f32 %v4403_v59, %v1893_v13  ;;  %v4534_v33 = vsub.f32 %v4406_v54, %v1893_v13  ;;  %v2023_v51 = vadd.f32 %v2561_v61, %v2559_v36  ;;  %v2563_v1 = vpop.eup %2562 }
 0x35a   : > { %1913 = vmax.xlane.f32.xlu1 %v1912_v21  ;;  %2015 = vadd.xlane.f32.xlu0 %v2014_v31  ;;  %v2565_v54 = vpop.eup %2564 }
 0x35b   : > { %v1979_v27 = vmul.f32 1.442695, %v4531_v15  ;;  %v1981_v23 = vmul.f32 1.442695, %v4534_v33  ;;  %v2026_v41 = vadd.f32 %v2565_v54, %v2563_v1 }
 0x35d   : > { %v2567_v32 = vpop.eup %2566  ;;  %2570 = vpow2.f32 %v1979_v27 }
 0x35e   : > { %v2569_v10 = vpop.eup %2568  ;;  %2572 = vpow2.f32 %v1981_v23 }
 0x35f   : > { %v2032_v55 = vadd.f32 %v2569_v10, %v2567_v32 }
 0x360   : > { %v1896_v2 = vpop.xlane.xlu1 %1895 }
 0x361   : > { %v4539_v38 = vsub.f32 %v4411_v11, %v1896_v2  ;;  %v4542_v59 = vsub.f32 %v4414_v19, %v1896_v2 }
 0x362   : > { %2018 = vadd.xlane.f32.xlu1 %v2017_v60  ;;  %2024 = vadd.xlane.f32.xlu0 %v2023_v51 }
 0x363   : > { %v1983_v50 = vmul.f32 1.442695, %v4539_v38  ;;  %v1985_v46 = vmul.f32 1.442695, %v4542_v59  ;;  %v2571_v11 = vpop.eup %2570 }
 0x364   : > { %v2573_v19 = vpop.eup %2572 }
 0x365   : > { %2574 = vpow2.f32 %v1983_v50  ;;  %v2035_v3 = vadd.f32 %v2573_v19, %v2571_v11 }
 0x366   : > { %2576 = vpow2.f32 %v1985_v46 }
 0x36a   : > { %2033 = vadd.xlane.f32.xlu0 %v2032_v55  ;;  %2027 = vadd.xlane.f32.xlu1 %v2026_v41 }
 0x36b   : > { %v2575_v57 = vpop.eup %2574 }
 0x36c   : > { %v2577_v48 = vpop.eup %2576 }
 0x36d   : > { %v2038_v43 = vadd.f32 %v2577_v48, %v2575_v57 }
 0x36f   : > { %2039 = vadd.xlane.f32.xlu2 %v2038_v43 }
 0x372   : > { %2036 = vadd.xlane.f32.xlu1 %v2035_v3 }
 0x37d   : > { %v1899_v28 = vpop.xlane.xlu2 %1898 }
 0x37e   : > { %v4547_v24 = vsub.f32 %v4419_v9, %v1899_v28  ;;  %v4550_v14 = vsub.f32 %v4422_v7, %v1899_v28 }
 0x380   : > { %v1987_v21 = vmul.f32 1.442695, %v4547_v24  ;;  %v1989_v31 = vmul.f32 1.442695, %v4550_v14 }
 0x382   : > { %2578 = vpow2.f32 %v1987_v21 }
 0x383   : > { %2580 = vpow2.f32 %v1989_v31 }
 0x385   : > { %v1902_v20 = vpop.xlane.xlu0 %1901 }
 0x386   : > { %v4555_v13 = vsub.f32 %v4427_v8, %v1902_v20  ;;  %v4558_v26 = vsub.f32 %v4430_v49, %v1902_v20 }
 0x388   : > { %v2579_v6 = vpop.eup %2578  ;;  %v1991_v9 = vmul.f32 1.442695, %v4555_v13  ;;  %v1993_v45 = vmul.f32 1.442695, %v4558_v26 }
 0x389   : > { %v2581_v7 = vpop.eup %2580 }
 0x38a   : > { %2582 = vpow2.f32 %v1991_v9  ;;  %v2041_v25 = vadd.f32 %v2581_v7, %v2579_v6 }
 0x38b   : > { %2584 = vpow2.f32 %v1993_v45 }
 0x38c   : > { %2042 = vadd.xlane.f32.xlu0 %v2041_v25 }
 0x390   : > { %v2583_v36 = vpop.eup %2582 }
 0x391   : > { %v2585_v61 = vpop.eup %2584 }
 0x392   : > { %v2044_v27 = vadd.f32 %v2585_v61, %v2583_v36 }
 0x394   : > { %2045 = vadd.xlane.f32.xlu1 %v2044_v27 }
 0x3a1   : > { %v1905_v60 = vpop.xlane.xlu1 %1904 }
 0x3a2   : > { %v4563_v8 = vsub.f32 %v4438_v0, %v1905_v60  ;;  %v4566_v49 = vsub.f32 %v4441_v30, %v1905_v60 }
 0x3a4   : > { %v1995_v51 = vmul.f32 1.442695, %v4563_v8  ;;  %v1997_v23 = vmul.f32 1.442695, %v4566_v49 }
 0x3a6   : > { %2586 = vpow2.f32 %v1995_v51 }
 0x3a7   : > { %2588 = vpow2.f32 %v1997_v23 }
 0x3a9   : > { %v1908_v2 = vpop.xlane.xlu2 %1907 }
 0x3aa   : > { %v4571_v1 = vsub.f32 %v4454_v37, %v1908_v2  ;;  %v4574_v54 = vsub.f32 %v4457_v4, %v1908_v2 }
 0x3ac   : > { %v2587_v0 = vpop.eup %2586  ;;  %v1999_v32 = vmul.f32 1.442695, %v4571_v1  ;;  %v2001_v30 = vmul.f32 1.442695, %v4574_v54 }
 0x3ad   : > { %v2589_v50 = vpop.eup %2588 }
 0x3ae   : > { %2590 = vpow2.f32 %v1999_v32  ;;  %v2047_v46 = vadd.f32 %v2589_v50, %v2587_v0 }
 0x3af   : > { %2592 = vpow2.f32 %v2001_v30 }
 0x3b0   : > { %2048 = vadd.xlane.f32.xlu2 %v2047_v46 }
 0x3b1   : > { %v2013_v10 = vpop.xlane.xlu2 %2012 }
 0x3b2   : > { %2594 = vlog2.f32 %v2013_v10 }
 0x3b4   : > { %v2591_v55 = vpop.eup %2590 }
 0x3b5   : > { %v2593_v37 = vpop.eup %2592 }
 0x3b6   : > { %v2050_v41 = vadd.f32 %v2593_v37, %v2591_v55 }
 0x3b8   : > { %v2595_v4 = vpop.eup %2594  ;;  %2051 = vadd.xlane.f32.xlu0 %v2050_v41 }
 0x3b9   : > { %v2060_v11 = vmul.f32 0.6931472, %v2595_v4  ;;  %v2022_v19 = vpop.xlane.xlu2 %2021 }
 0x3ba   : > { %2596 = vlog2.f32 %v2022_v19 }
 0x3bb   : > { %v2091_v57 = vsub.f32 %v4435_v39, %v2060_v11  ;;  %v2092_v48 = vsub.f32 %v4444_v29, %v2060_v11 }
 0x3bd   : > { %2123 = vst [vmem:[%s4583_s25] sm:$0xff] %v2091_v57 }
 0x3be   : > { %2124 = vst [vmem:[%s4583_s25 + $0x8] sm:$0xff] %v2092_v48 }
 0x3c0   : > { %v2597_v43 = vpop.eup %2596 }
 0x3c1   : > { %v2066_v3 = vmul.f32 0.6931472, %v2597_v43  ;;  %v2031_v28 = vpop.xlane.xlu2 %2030 }
 0x3c2   : > { %2598 = vlog2.f32 %v2031_v28 }
 0x3c3   : > { %v2097_v21 = vsub.f32 %v4451_v58, %v2066_v3  ;;  %v2098_v31 = vsub.f32 %v4460_v63, %v2066_v3 }
 0x3c5   : > { %2129 = vst [vmem:[%s4583_s25 + $0x30] sm:$0xff] %v2097_v21  ;;  %v1911_v39 = vpop.xlane.xlu0 %1910 }
 0x3c6   : > { %2130 = vst [vmem:[%s4583_s25 + $0x38] sm:$0xff] %v2098_v31  ;;  %v4592_v29 = vsub.f32 %v4492_v22, %v1911_v39  ;;  %v4595_v20 = vsub.f32 %v4495_v52, %v1911_v39 }
 0x3c8   : > { %v2599_v6 = vpop.eup %2598  ;;  %v2003_v9 = vmul.f32 1.442695, %v4592_v29  ;;  %v2005_v45 = vmul.f32 1.442695, %v4595_v20 }
 0x3c9   : > { %v2072_v7 = vmul.f32 0.6931472, %v2599_v6 }
 0x3ca   : > { %2600 = vpow2.f32 %v2003_v9 }
 0x3cb   : > { %v2103_v58 = vsub.f32 %v4467_v47, %v2072_v7  ;;  %v2104_v63 = vsub.f32 %v4470_v56, %v2072_v7  ;;  %2602 = vpow2.f32 %v2005_v45 }
 0x3cd   : > { %2135 = vst [vmem:[%s4583_s25 + $0x60] sm:$0xff] %v2103_v58  ;;  %v1914_v25 = vpop.xlane.xlu1 %1913  ;;  %v2016_v36 = vpop.xlane.xlu0 %2015 }
 0x3ce   : > { %2136 = vst [vmem:[%s4583_s25 + $0x68] sm:$0xff] %v2104_v63  ;;  %v4604_v22 = vsub.f32 %v4516_v5, %v1914_v25  ;;  %v4607_v52 = vsub.f32 %v4519_v40, %v1914_v25  ;;  %2604 = vlog2.f32 %v2016_v36 }
 0x3d0   : > { %v2601_v61 = vpop.eup %2600  ;;  %v2007_v27 = vmul.f32 1.442695, %v4604_v22  ;;  %v2009_v60 = vmul.f32 1.442695, %v4607_v52 }
 0x3d1   : > { %v2603_v47 = vpop.eup %2602 }
 0x3d2   : > { %2606 = vpow2.f32 %v2007_v27  ;;  %v2053_v56 = vadd.f32 %v2603_v47, %v2601_v61 }
 0x3d3   : > { %2608 = vpow2.f32 %v2009_v60 }
 0x3d4   : > { %v2605_v51 = vpop.eup %2604  ;;  %2054 = vadd.xlane.f32.xlu1 %v2053_v56 }
 0x3d5   : > { %v2062_v23 = vmul.f32 0.6931472, %v2605_v51  ;;  %v2019_v5 = vpop.xlane.xlu1 %2018  ;;  %v2025_v2 = vpop.xlane.xlu0 %2024 }
 0x3d6   : > { %2610 = vlog2.f32 %v2019_v5 }
 0x3d7   : > { %v2093_v40 = vsub.f32 %v4475_v42, %v2062_v23  ;;  %v2094_v0 = vsub.f32 %v4478_v53, %v2062_v23  ;;  %2612 = vlog2.f32 %v2025_v2 }
 0x3d8   : > { %v2607_v32 = vpop.eup %2606 }
 0x3d9   : > { %v2609_v30 = vpop.eup %2608  ;;  %2125 = vst [vmem:[%s4583_s25 + $0x10] sm:$0xff] %v2093_v40 }
 0x3da   : > { %2126 = vst [vmem:[%s4583_s25 + $0x18] sm:$0xff] %v2094_v0  ;;  %v2056_v50 = vadd.f32 %v2609_v30, %v2607_v32 }
 0x3dc   : > { %v2611_v46 = vpop.eup %2610  ;;  %2057 = vadd.xlane.f32.xlu2 %v2056_v50 }
 0x3dd   : > { %v2613_v10 = vpop.eup %2612  ;;  %v2064_v55 = vmul.f32 0.6931472, %v2611_v46  ;;  %v2028_v37 = vpop.xlane.xlu1 %2027 }
 0x3de   : > { %v2034_v41 = vpop.xlane.xlu0 %2033  ;;  %v2068_v4 = vmul.f32 0.6931472, %v2613_v10  ;;  %2614 = vlog2.f32 %v2028_v37 }
 0x3df   : > { %v2095_v42 = vsub.f32 %v4483_v34, %v2064_v55  ;;  %v2096_v53 = vsub.f32 %v4486_v17, %v2064_v55  ;;  %2616 = vlog2.f32 %v2034_v41 }
 0x3e0   : > { %v2099_v11 = vsub.f32 %v4489_v12, %v2068_v4  ;;  %v2100_v19 = vsub.f32 %v4498_v44, %v2068_v4 }
 0x3e1   : > { %2127 = vst [vmem:[%s4583_s25 + $0x20] sm:$0xff] %v2095_v42 }
 0x3e2   : > { %2128 = vst [vmem:[%s4583_s25 + $0x28] sm:$0xff] %v2096_v53  ;;  %v2040_v57 = vpop.xlane.xlu2 %2039 }
 0x3e3   : > { %2131 = vst [vmem:[%s4583_s25 + $0x40] sm:$0xff] %v2099_v11  ;;  %2618 = vlog2.f32 %v2040_v57 }
 0x3e4   : > { %v2615_v48 = vpop.eup %2614  ;;  %2132 = vst [vmem:[%s4583_s25 + $0x48] sm:$0xff] %v2100_v19 }
 0x3e5   : > { %v2617_v43 = vpop.eup %2616  ;;  %v2070_v34 = vmul.f32 0.6931472, %v2615_v48  ;;  %v2037_v3 = vpop.xlane.xlu1 %2036 }
 0x3e6   : > { %v2074_v17 = vmul.f32 0.6931472, %v2617_v43  ;;  %2620 = vlog2.f32 %v2037_v3 }
 0x3e7   : > { %v2101_v12 = vsub.f32 %v4507_v62, %v2070_v34  ;;  %v2102_v44 = vsub.f32 %v4510_v18, %v2070_v34 }
 0x3e8   : > { %v2105_v28 = vsub.f32 %v4513_v35, %v2074_v17  ;;  %v2106_v21 = vsub.f32 %v4522_v16, %v2074_v17 }
 0x3e9   : > { %2133 = vst [vmem:[%s4583_s25 + $0x50] sm:$0xff] %v2101_v12  ;;  %v2619_v31 = vpop.eup %2618 }
 0x3ea   : > { %2134 = vst [vmem:[%s4583_s25 + $0x58] sm:$0xff] %v2102_v44  ;;  %v2078_v39 = vmul.f32 0.6931472, %v2619_v31 }
 0x3eb   : > { %2137 = vst [vmem:[%s4583_s25 + $0x70] sm:$0xff] %v2105_v28 }
 0x3ec   : > { %v2621_v6 = vpop.eup %2620  ;;  %2138 = vst [vmem:[%s4583_s25 + $0x78] sm:$0xff] %v2106_v21  ;;  %v2109_v9 = vsub.f32 %v4539_v38, %v2078_v39  ;;  %v2110_v62 = vsub.f32 %v4542_v59, %v2078_v39 }
 0x3ed   : > { %v2076_v18 = vmul.f32 0.6931472, %v2621_v6 }
 0x3ee   : > { %2141 = vst [vmem:[%s4583_s25 + $0x90] sm:$0xff] %v2109_v9 }
 0x3ef   : > { %v2107_v35 = vsub.f32 %v4531_v15, %v2076_v18  ;;  %v2108_v16 = vsub.f32 %v4534_v33, %v2076_v18  ;;  %2142 = vst [vmem:[%s4583_s25 + $0x98] sm:$0xff] %v2110_v62 }
 0x3f1   : > { %2139 = vst [vmem:[%s4583_s25 + $0x80] sm:$0xff] %v2107_v35 }
 0x3f2   : > { %2140 = vst [vmem:[%s4583_s25 + $0x88] sm:$0xff] %v2108_v16 }
 0x3ff   : > { %v2043_v45 = vpop.xlane.xlu0 %2042 }
 0x400   : > { %2622 = vlog2.f32 %v2043_v45 }
 0x406   : > { %v2623_v7 = vpop.eup %2622 }
 0x407   : > { %v2080_v58 = vmul.f32 0.6931472, %v2623_v7  ;;  %v2046_v38 = vpop.xlane.xlu1 %2045 }
 0x408   : > { %2624 = vlog2.f32 %v2046_v38 }
 0x409   : > { %v2111_v59 = vsub.f32 %v4547_v24, %v2080_v58  ;;  %v2112_v63 = vsub.f32 %v4550_v14, %v2080_v58 }
 0x40b   : > { %2143 = vst [vmem:[%s4583_s25 + $0xa0] sm:$0xff] %v2111_v59 }
 0x40c   : > { %2144 = vst [vmem:[%s4583_s25 + $0xa8] sm:$0xff] %v2112_v63 }
 0x40e   : > { %v2625_v15 = vpop.eup %2624 }
 0x40f   : > { %v2082_v33 = vmul.f32 0.6931472, %v2625_v15 }
 0x411   : > { %v2113_v25 = vsub.f32 %v4555_v13, %v2082_v33  ;;  %v2114_v36 = vsub.f32 %v4558_v26, %v2082_v33 }
 0x413   : > { %2145 = vst [vmem:[%s4583_s25 + $0xb0] sm:$0xff] %v2113_v25 }
 0x414   : > { %2146 = vst [vmem:[%s4583_s25 + $0xb8] sm:$0xff] %v2114_v36 }
 0x423   : > { %v2049_v61 = vpop.xlane.xlu2 %2048 }
 0x424   : > { %2626 = vlog2.f32 %v2049_v61 }
 0x42a   : > { %v2627_v27 = vpop.eup %2626 }
 0x42b   : > { %v2084_v24 = vmul.f32 0.6931472, %v2627_v27  ;;  %v2052_v60 = vpop.xlane.xlu0 %2051 }
 0x42c   : > { %2628 = vlog2.f32 %v2052_v60 }
 0x42d   : > { %v2115_v14 = vsub.f32 %v4563_v8, %v2084_v24  ;;  %v2116_v47 = vsub.f32 %v4566_v49, %v2084_v24 }
 0x42f   : > { %2147 = vst [vmem:[%s4583_s25 + $0xc0] sm:$0xff] %v2115_v14 }
 0x430   : > { %2148 = vst [vmem:[%s4583_s25 + $0xc8] sm:$0xff] %v2116_v47 }
 0x432   : > { %v2629_v13 = vpop.eup %2628 }
 0x433   : > { %v2086_v26 = vmul.f32 0.6931472, %v2629_v13 }
 0x435   : > { %v2117_v56 = vsub.f32 %v4571_v1, %v2086_v26  ;;  %v2118_v51 = vsub.f32 %v4574_v54, %v2086_v26 }
 0x437   : > { %2149 = vst [vmem:[%s4583_s25 + $0xd0] sm:$0xff] %v2117_v56 }
 0x438   : > { %2150 = vst [vmem:[%s4583_s25 + $0xd8] sm:$0xff] %v2118_v51 }
 0x447   : > { %v2055_v23 = vpop.xlane.xlu1 %2054 }
 0x448   : > { %2630 = vlog2.f32 %v2055_v23 }
 0x44e   : > { %v2631_v5 = vpop.eup %2630 }
 0x44f   : > { %v2088_v8 = vmul.f32 0.6931472, %v2631_v5  ;;  %v2058_v2 = vpop.xlane.xlu2 %2057 }
 0x450   : > { %2632 = vlog2.f32 %v2058_v2 }
 0x451   : > { %v2119_v49 = vsub.f32 %v4592_v29, %v2088_v8  ;;  %v2120_v40 = vsub.f32 %v4595_v20, %v2088_v8 }
 0x453   : > { %2151 = vst [vmem:[%s4583_s25 + $0xe0] sm:$0xff] %v2119_v49 }
 0x454   : > { %2152 = vst [vmem:[%s4583_s25 + $0xe8] sm:$0xff] %v2120_v40 }
 0x456   : > { %v2633_v1 = vpop.eup %2632 }
 0x457   : > { %v2090_v54 = vmul.f32 0.6931472, %v2633_v1 }
 0x459   : > { %v2121_v0 = vsub.f32 %v4604_v22, %v2090_v54  ;;  %v2122_v32 = vsub.f32 %v4607_v52, %v2090_v54 }
 0x45b   : > { %2153 = vst [vmem:[%s4583_s25 + $0xf0] sm:$0xff] %v2121_v0 }
 0x45c   : > { %2154 = vst [vmem:[%s4583_s25 + $0xf8] sm:$0xff] %v2122_v32 }
 0x45d   : > { %2667 = shalt.err (!%p2664_p3)
}
 0x45e   : > { %s2712_s17 = smov 256   ;;  %s2713_s23 = smov 16  }
 0x45f   : > { %2409 = dma.vmem_to_hbm [thread:$0]  (%p2782_p5), %s2170_s8, 4096, %s2172_s9, %s2156_s22, %s2712_s17, %s2712_s17, %s2713_s23  }
 0x460 PF: > { %p2415_p4 = scmp.ge.s32.totalorder %s2702_s21, 2  ;;  %s2186_s25 = sand.u32 1, %s2690_s18  }
 0x461   : > { %s2187_s26 = scalar_lea.sflag [#allocation3], %s2186_s25 }
 0x462   : > { %p2412_p7 = pnand %p2415_p4, %p2786_p6 }
 0x464   : > { %p2413_p8 = pneg %p2412_p7 }
 0x466   : > { %2685 = dma.done.wait (%p2413_p8), %s2187_s26, 4096  }
 0x467   : > { %2687 = vsyncadd (%p2413_p8), %s2187_s26, 4294963200  ;;  %p15_p9 = scmp.ge.s32.totalorder %s2769_s24, 4   ;;  %s4791_s18 = smov %s2694_s19 }
 0x468   : > { %s4792_s19 = smov %s2698_s20  ;;  %s4793_s20 = smov %s2780_s27 }
 0x469   : > { %s4794_s21 = smov %s2769_s24  ;;  %17 = sbr.rel (!%p15_p9) target bundleno = 3 (0x3), region = 75 }
 0x46e   :  { %2193 = vsyncpa [#allocation3], 1 }
 0x46f   :  { %2195 = vsyncpa [#allocation3 + $0x1], 1 }

</bundles_post_ra>
